<compile_context>
chip_gen: v5e
topology: v5e:2x2
jax: 0.10.0
libtpu: 0.0.40
codegen_flags: <defaults>
</compile_context>

<pallas_src>
import jax
import jax.numpy as jnp
from jax.experimental import pallas as pl
from jax.experimental.pallas import tpu as pltpu

# ----------------------------------------------------------------------------
# Model configuration (synthetic param_dict, like the per-layer filter sizes
# the real MetaNet predicts).
# ----------------------------------------------------------------------------
PARAM_DICT = {
    "conv1_weight": 64,
    "conv2_weight": 128,
    "conv3_weight": 128,
    "conv4_weight": 64,
}
G = len(PARAM_DICT)              # number of groups / fc heads
IN_FEATURES = 1920               # mean/std feature size
GROUP = 128                      # per-group hidden width
HIDDEN = GROUP * G               # 512
OUT_SIZES = tuple(PARAM_DICT.values())
OUT_TOTAL = sum(OUT_SIZES)       # 384 = 3 * 128 -> lane-dense fused output

# K-tiling of the hidden matmul reduction axis.  Few, large tiles: per-step
# overhead (~0.35 us) stays negligible on v7x, while DMA of the bf16 weight
# slab overlaps compute on all generations.
TK = 640
assert IN_FEATURES % TK == 0 and TK % 128 == 0
KT = IN_FEATURES // TK           # 3 grid steps


# ----------------------------------------------------------------------------
# Pallas kernel
# ----------------------------------------------------------------------------
def metanet_kernel(x_ref, wh_ref, bh_ref, wa_ref, ba_ref, wf_ref, bf_ref,
                   o_ref, acc_ref):
    k = pl.program_id(0)

    @pl.when(k == 0)
    def _init():
        acc_ref[...] = jnp.zeros_like(acc_ref)

    # Stream one (TK, HIDDEN) bf16 slab of the hidden weight per grid step,
    # accumulate in f32 on the MXU.
    acc_ref[...] += jnp.dot(
        x_ref[...].astype(jnp.bfloat16), wh_ref[...],
        preferred_element_type=jnp.float32)

    @pl.when(k == pl.num_programs(0) - 1)
    def _epilogue():
        b = acc_ref.shape[0]
        hidden = jnp.maximum(acc_ref[...] + bh_ref[...], 0.0)        # (B, 512)

        # ChannelAttention (group-wise squeeze-excitation): one reshape + one
        # lane reduction instead of per-group slices + concat.
        h3 = hidden.reshape(b, G, GROUP)                             # (B, G, 128)
        means = jnp.mean(h3, axis=-1)                                # (B, G)
        att = jax.nn.sigmoid(
            jnp.dot(means, wa_ref[...], preferred_element_type=jnp.float32)
            + ba_ref[...])                                           # (B, G)
        scaled = (h3 * att[:, :, None]).reshape(b, HIDDEN)           # (B, 512)

        # All G fc heads fused as a single block-diagonal bf16 matmul writing
        # one lane-dense (B, 384) output.
        out = jnp.dot(scaled.astype(jnp.bfloat16), wf_ref[...],
                      preferred_element_type=jnp.float32) + bf_ref[...]
        o_ref[...] = out.astype(o_ref.dtype)


# ----------------------------------------------------------------------------
# Wrapper
# ----------------------------------------------------------------------------
@jax.jit
def metanet_forward(x, wh_bf16, bh, wa, ba, wf_bf16, bf):
    B = x.shape[0]
    fused = pl.pallas_call(
        metanet_kernel,
        out_shape=jax.ShapeDtypeStruct((B, OUT_TOTAL), jnp.float32),
        grid=(KT,),
        in_specs=[
            pl.BlockSpec((B, TK), lambda k: (0, k)),           # x (f32, tiny)
            pl.BlockSpec((TK, HIDDEN), lambda k: (k, 0)),      # wh bf16, K-tiled
            pl.BlockSpec((1, HIDDEN), lambda k: (0, 0)),       # bh
            pl.BlockSpec((G, G), lambda k: (0, 0)),            # attention W
            pl.BlockSpec((1, G), lambda k: (0, 0)),            # attention b
            pl.BlockSpec((HIDDEN, OUT_TOTAL), lambda k: (0, 0)),  # block-diag heads
            pl.BlockSpec((1, OUT_TOTAL), lambda k: (0, 0)),    # concat head bias
        ],
        out_specs=pl.BlockSpec((B, OUT_TOTAL), lambda k: (0, 0)),
        scratch_shapes=[pltpu.VMEM((B, HIDDEN), jnp.float32)],
        compiler_params=pltpu.CompilerParams(
            dimension_semantics=("arbitrary",),
        ),
    )(x, wh_bf16, bh, wa, ba, wf_bf16, bf)

    # Split the fused lane-dense output back into per-head slices.
    outs = []
    off = 0
    for p in OUT_SIZES:
        outs.append(fused[:, off:off + p])
        off += p
    return tuple(outs)


def pack_head_params(fc_ws, fc_bs):
    """Stack per-head (128, p_i) weights into one block-diagonal (512, 384)
    bf16 matrix and concatenate the biases into (1, 384)."""
    wf = jnp.zeros((HIDDEN, OUT_TOTAL), jnp.float32)
    b_parts = []
    off = 0
    for i, (w, b) in enumerate(zip(fc_ws, fc_bs)):
        p = w.shape[1]
        wf = wf.at[i * GROUP:(i + 1) * GROUP, off:off + p].set(w)
        b_parts.append(b.reshape(1, p))
        off += p
    return wf.astype(jnp.bfloat16), jnp.concatenate(b_parts, axis=-1)


# ----------------------------------------------------------------------------
# Pure-JAX reference (mirrors the kernel's bf16 weight / f32-accumulate math).
# ----------------------------------------------------------------------------
def metanet_reference(x, wh_bf16, bh, wa, ba, fc_ws_bf16, fc_bs):
    hidden = jnp.maximum(
        jnp.dot(x.astype(jnp.bfloat16), wh_bf16,
                preferred_element_type=jnp.float32) + bh, 0.0)
    means = hidden.reshape(x.shape[0], G, GROUP).mean(axis=-1)
    att = jax.nn.sigmoid(means @ wa + ba)
    outs = []
    for i in range(G):
        h_i = (hidden[:, i * GROUP:(i + 1) * GROUP]
               * att[:, i:i + 1]).astype(jnp.bfloat16)
        outs.append(jnp.dot(h_i, fc_ws_bf16[i],
                            preferred_element_type=jnp.float32) + fc_bs[i])
    return outs


# ----------------------------------------------------------------------------
# Deterministic parameter construction + driver
# ----------------------------------------------------------------------------
def init_params(key):
    keys = jax.random.split(key, 4 + 2 * G)
    s = 0.02
    wh = s * jax.random.normal(keys[0], (IN_FEATURES, HIDDEN), jnp.float32)
    bh = s * jax.random.normal(keys[1], (1, HIDDEN), jnp.float32)
    wa = s * jax.random.normal(keys[2], (G, G), jnp.float32)
    ba = s * jax.random.normal(keys[3], (1, G), jnp.float32)
    fc_ws, fc_bs = [], []
    for i, p in enumerate(PARAM_DICT.values()):
        fc_ws.append(s * jax.random.normal(keys[4 + 2 * i], (GROUP, p), jnp.float32))
        fc_bs.append(s * jax.random.normal(keys[5 + 2 * i], (1, p), jnp.float32))
    return wh, bh, wa, ba, fc_ws, fc_bs


if __name__ == "__main__":
    key = jax.random.PRNGKey(0)
    k_x, k_p = jax.random.split(key)

    B = 2
    x = jax.random.normal(k_x, (B, IN_FEATURES), jnp.float32)
    wh, bh, wa, ba, fc_ws, fc_bs = init_params(k_p)

    # bf16 weight streaming (HBM-bandwidth-bound kernel), f32 biases.
    wh_bf16 = wh.astype(jnp.bfloat16)
    fc_ws_bf16 = [w.astype(jnp.bfloat16) for w in fc_ws]
    wf_bf16, bf = pack_head_params(fc_ws, fc_bs)

    outs = metanet_forward(x, wh_bf16, bh, wa, ba, wf_bf16, bf)
    outs = jax.block_until_ready(outs)

    # Assemble the dict exactly like the PyTorch module's `filters` return.
    filters = {name: o for name, o in zip(PARAM_DICT.keys(), outs)}

    # Numerical sanity check against a pure-JAX reference with matching dtypes.
    refs = metanet_reference(x, wh_bf16, bh, wa, ba, fc_ws_bf16, fc_bs)
    for (name, got), ref in zip(filters.items(), refs):
        assert got.shape == ref.shape, (name, got.shape, ref.shape)
        assert jnp.allclose(got, ref, atol=1e-2, rtol=1e-2), name

    print("KERNEL_OK")
</pallas_src>

<mosaic_0001>
module attributes {stable_mosaic.version = 11 : i64} {
  func.func @metanet_kernel(%arg0: i32, %arg1: memref<2x640xf32, #tpu.memory_space<vmem>>, %arg2: memref<640x512xbf16, #tpu.memory_space<vmem>>, %arg3: memref<1x512xf32, #tpu.memory_space<vmem>>, %arg4: memref<4x4xf32, #tpu.memory_space<vmem>>, %arg5: memref<1x4xf32, #tpu.memory_space<vmem>>, %arg6: memref<512x384xbf16, #tpu.memory_space<vmem>>, %arg7: memref<1x384xf32, #tpu.memory_space<vmem>>, %arg8: memref<2x384xf32, #tpu.memory_space<vmem>>, %arg9: memref<2x512xf32, #tpu.memory_space<vmem>>) attributes {dimension_semantics = [#tpu.dimension_semantics<arbitrary>], iteration_bounds = array<i64: 3>, scalar_prefetch = 0 : i64, scratch_operands = 1 : i64, tpu.core_type = #tpu.core_type<tc>, window_params = [{transform_indices = @transform_0, window_bounds = array<i64: 2, 640>}, {transform_indices = @transform_1, window_bounds = array<i64: 640, 512>}, {pipeline_mode = #tpu.pipeline_mode<synchronous>, transform_indices = @transform_2, window_bounds = array<i64: 1, 512>}, {pipeline_mode = #tpu.pipeline_mode<synchronous>, transform_indices = @transform_3, window_bounds = array<i64: 4, 4>}, {pipeline_mode = #tpu.pipeline_mode<synchronous>, transform_indices = @transform_4, window_bounds = array<i64: 1, 4>}, {pipeline_mode = #tpu.pipeline_mode<synchronous>, transform_indices = @transform_5, window_bounds = array<i64: 512, 384>}, {pipeline_mode = #tpu.pipeline_mode<synchronous>, transform_indices = @transform_6, window_bounds = array<i64: 1, 384>}, {pipeline_mode = #tpu.pipeline_mode<synchronous>, transform_indices = @transform_7, window_bounds = array<i64: 2, 384>}]} {
    %c0_i32 = arith.constant 0 : i32
    %0 = arith.cmpi eq, %arg0, %c0_i32 : i32
    %1 = arith.extui %0 : i1 to i32
    %c0_i32_0 = arith.constant 0 : i32
    %2 = arith.cmpi ne, %1, %c0_i32_0 : i32
    scf.if %2 {
      %cst_9 = arith.constant 0.000000e+00 : f32
      %13 = vector.broadcast %cst_9 : f32 to vector<2x512xf32>
      %c0_10 = arith.constant 0 : index
      %c0_11 = arith.constant 0 : index
      %14 = vector.load %arg9[%c0_10, %c0_11] : memref<2x512xf32, #tpu.memory_space<vmem>>, vector<2x512xf32>
      tpu.vector_store %arg9[%c0_10, %c0_11], %13 {strides = array<i32>} : memref<2x512xf32, #tpu.memory_space<vmem>>, vector<2x512xf32>,
    } else {
    }
    %c0 = arith.constant 0 : index
    %c0_1 = arith.constant 0 : index
    %3 = vector.load %arg9[%c0, %c0_1] : memref<2x512xf32, #tpu.memory_space<vmem>>, vector<2x512xf32>
    %c0_2 = arith.constant 0 : index
    %c0_3 = arith.constant 0 : index
    %4 = vector.load %arg1[%c0_2, %c0_3] : memref<2x640xf32, #tpu.memory_space<vmem>>, vector<2x640xf32>
    %5 = arith.truncf %4 : vector<2x640xf32> to vector<2x640xbf16>
    %c0_4 = arith.constant 0 : index
    %c0_5 = arith.constant 0 : index
    %6 = vector.load %arg2[%c0_4, %c0_5] : memref<640x512xbf16, #tpu.memory_space<vmem>>, vector<640x512xbf16>
    %cst = arith.constant dense<0.000000e+00> : vector<2x512xf32>
    %7 = tpu.matmul %5, %6, %cst {dimension_numbers = #tpu.dot_dimension_numbers<[1], [0], [0], [1], [0, 0, 1, 1], [], []>} : vector<2x640xbf16>, vector<640x512xbf16>, vector<2x512xf32> -> vector<2x512xf32>
    %8 = arith.addf %3, %7 : vector<2x512xf32>
    %c0_6 = arith.constant 0 : index
    %c0_7 = arith.constant 0 : index
    %9 = vector.load %arg9[%c0_6, %c0_7] : memref<2x512xf32, #tpu.memory_space<vmem>>, vector<2x512xf32>
    tpu.vector_store %arg9[%c0_6, %c0_7], %8 {strides = array<i32>} : memref<2x512xf32, #tpu.memory_space<vmem>>, vector<2x512xf32>,
    %c2_i32 = arith.constant 2 : i32
    %10 = arith.cmpi eq, %arg0, %c2_i32 : i32
    %11 = arith.extui %10 : i1 to i32
    %c0_i32_8 = arith.constant 0 : i32
    %12 = arith.cmpi ne, %11, %c0_i32_8 : i32
    scf.if %12 {
      %c0_9 = arith.constant 0 : index
      %c0_10 = arith.constant 0 : index
      %13 = vector.load %arg9[%c0_9, %c0_10] : memref<2x512xf32, #tpu.memory_space<vmem>>, vector<2x512xf32>
      %c0_11 = arith.constant 0 : index
      %c0_12 = arith.constant 0 : index
      %14 = vector.load %arg3[%c0_11, %c0_12] : memref<1x512xf32, #tpu.memory_space<vmem>>, vector<1x512xf32>
      %15 = vector.broadcast %14 : vector<1x512xf32> to vector<2x512xf32>
      %16 = arith.addf %13, %15 : vector<2x512xf32>
      %cst_13 = arith.constant 0.000000e+00 : f32
      %17 = vector.broadcast %cst_13 : f32 to vector<2x512xf32>
      %18 = arith.maximumf %16, %17 : vector<2x512xf32>
      %19 = vector.shape_cast %18 : vector<2x512xf32> to vector<2x4x128xf32>
      %cst_14 = arith.constant dense<0.000000e+00> : vector<2x4xf32>
      %20 = vector.multi_reduction <add>, %19, %cst_14 [2] : vector<2x4x128xf32> to vector<2x4xf32>
      %cst_15 = arith.constant 1.280000e+02 : f32
      %21 = vector.broadcast %cst_15 : f32 to vector<2x4xf32>
      %22 = arith.divf %20, %21 : vector<2x4xf32>
      %c0_16 = arith.constant 0 : index
      %c0_17 = arith.constant 0 : index
      %23 = vector.load %arg4[%c0_16, %c0_17] : memref<4x4xf32, #tpu.memory_space<vmem>>, vector<4x4xf32>
      %cst_18 = arith.constant dense<0.000000e+00> : vector<2x4xf32>
      %24 = tpu.matmul %22, %23, %cst_18 {dimension_numbers = #tpu.dot_dimension_numbers<[1], [0], [0], [1], [0, 0, 1, 1], [], []>} : vector<2x4xf32>, vector<4x4xf32>, vector<2x4xf32> -> vector<2x4xf32>
      %c0_19 = arith.constant 0 : index
      %c0_20 = arith.constant 0 : index
      %25 = vector.load %arg5[%c0_19, %c0_20] : memref<1x4xf32, #tpu.memory_space<vmem>>, vector<1x4xf32>
      %26 = vector.broadcast %25 : vector<1x4xf32> to vector<2x4xf32>
      %27 = arith.addf %24, %26 : vector<2x4xf32>
      %28 = arith.negf %27 : vector<2x4xf32>
      %29 = math.exp %28 : vector<2x4xf32>
      %cst_21 = arith.constant 1.000000e+00 : f32
      %30 = vector.broadcast %cst_21 : f32 to vector<2x4xf32>
      %31 = arith.addf %30, %29 : vector<2x4xf32>
      %32 = arith.divf %30, %31 : vector<2x4xf32>
      %33 = vector.shape_cast %32 : vector<2x4xf32> to vector<2x4x1xf32>
      %34 = vector.broadcast %33 : vector<2x4x1xf32> to vector<2x4x128xf32>
      %35 = arith.mulf %19, %34 : vector<2x4x128xf32>
      %36 = vector.shape_cast %35 : vector<2x4x128xf32> to vector<2x512xf32>
      %37 = arith.truncf %36 : vector<2x512xf32> to vector<2x512xbf16>
      %c0_22 = arith.constant 0 : index
      %c0_23 = arith.constant 0 : index
      %38 = vector.load %arg6[%c0_22, %c0_23] : memref<512x384xbf16, #tpu.memory_space<vmem>>, vector<512x384xbf16>
      %cst_24 = arith.constant dense<0.000000e+00> : vector<2x384xf32>
      %39 = tpu.matmul %37, %38, %cst_24 {dimension_numbers = #tpu.dot_dimension_numbers<[1], [0], [0], [1], [0, 0, 1, 1], [], []>} : vector<2x512xbf16>, vector<512x384xbf16>, vector<2x384xf32> -> vector<2x384xf32>
      %c0_25 = arith.constant 0 : index
      %c0_26 = arith.constant 0 : index
      %40 = vector.load %arg7[%c0_25, %c0_26] : memref<1x384xf32, #tpu.memory_space<vmem>>, vector<1x384xf32>
      %41 = vector.broadcast %40 : vector<1x384xf32> to vector<2x384xf32>
      %42 = arith.addf %39, %41 : vector<2x384xf32>
      %c0_27 = arith.constant 0 : index
      %c0_28 = arith.constant 0 : index
      %43 = vector.load %arg8[%c0_27, %c0_28] : memref<2x384xf32, #tpu.memory_space<vmem>>, vector<2x384xf32>
      tpu.vector_store %arg8[%c0_27, %c0_28], %42 {strides = array<i32>} : memref<2x384xf32, #tpu.memory_space<vmem>>, vector<2x384xf32>,
    } else {
    }
    return
  }
  func.func @transform_0(%arg0: i32) -> (i32, i32) {
    %c0_i32 = arith.constant 0 : i32
    %c0_i32_0 = arith.constant 0 : i32
    return %c0_i32, %arg0 : i32, i32
  }
  func.func @transform_1(%arg0: i32) -> (i32, i32) {
    %c0_i32 = arith.constant 0 : i32
    %c0_i32_0 = arith.constant 0 : i32
    return %arg0, %c0_i32 : i32, i32
  }
  func.func @transform_2(%arg0: i32) -> (i32, i32) {
    %c0_i32 = arith.constant 0 : i32
    %c0_i32_0 = arith.constant 0 : i32
    %c0_i32_1 = arith.constant 0 : i32
    return %c0_i32, %c0_i32_0 : i32, i32
  }
  func.func @transform_3(%arg0: i32) -> (i32, i32) {
    %c0_i32 = arith.constant 0 : i32
    %c0_i32_0 = arith.constant 0 : i32
    %c0_i32_1 = arith.constant 0 : i32
    return %c0_i32, %c0_i32_0 : i32, i32
  }
  func.func @transform_4(%arg0: i32) -> (i32, i32) {
    %c0_i32 = arith.constant 0 : i32
    %c0_i32_0 = arith.constant 0 : i32
    %c0_i32_1 = arith.constant 0 : i32
    return %c0_i32, %c0_i32_0 : i32, i32
  }
  func.func @transform_5(%arg0: i32) -> (i32, i32) {
    %c0_i32 = arith.constant 0 : i32
    %c0_i32_0 = arith.constant 0 : i32
    %c0_i32_1 = arith.constant 0 : i32
    return %c0_i32, %c0_i32_0 : i32, i32
  }
  func.func @transform_6(%arg0: i32) -> (i32, i32) {
    %c0_i32 = arith.constant 0 : i32
    %c0_i32_0 = arith.constant 0 : i32
    %c0_i32_1 = arith.constant 0 : i32
    return %c0_i32, %c0_i32_0 : i32, i32
  }
  func.func @transform_7(%arg0: i32) -> (i32, i32) {
    %c0_i32 = arith.constant 0 : i32
    %c0_i32_0 = arith.constant 0 : i32
    %c0_i32_1 = arith.constant 0 : i32
    return %c0_i32, %c0_i32_0 : i32, i32
  }
}

</mosaic_0001>

<bundles_post_ra>
// kernel: metanet_forward.1
= control target key start
LH: loop header
LB: loop body
LE: loop exit
PB: predicated region body
PF: predicated region fallthrough
CT: control target
= control target key end

     0   :  { %s5169_s0 = inlined_call_operand.hbm [shape: f32[2,1920], index: 0, kind: input, shape index: {}]   ;;  %s5170_s1 = inlined_call_operand.hbm [shape: bf16[1920,512], index: 1, kind: input, shape index: {}]   ;;  %s5171_s2 = inlined_call_operand.hbm [shape: f32[1,512], index: 2, kind: input, shape index: {}]   ;;  %s5172_s3 = inlined_call_operand.hbm [shape: f32[4,4], index: 3, kind: input, shape index: {}]   ;;  %s5173_s4 = inlined_call_operand.hbm [shape: f32[1,4], index: 4, kind: input, shape index: {}]   ;;  %s5174_s5 = inlined_call_operand.hbm [shape: bf16[512,384], index: 5, kind: input, shape index: {}]   ;;  %s5175_s6 = inlined_call_operand.hbm [shape: f32[1,384], index: 6, kind: input, shape index: {}]   ;;  %s5176_s7 = inlined_call_operand.vmem [shape: f32[2,384], index: 7, kind: output, shape index: {}]  }
   0x1   :  { %5177 = sst [smem:[#allocation19_spill]] %s5171_s2 }
   0x2   :  { %12 = vsyncpa [#allocation4], 0 }
   0x3   :  { %14 = vsyncpa [#allocation4 + $0x1], 0 }
   0x4   :  { %15 = vsyncpa [#allocation6], 0 }
   0x5   :  { %17 = vsyncpa [#allocation6 + $0x1], 0 }
   0x6   :  { %18 = vsyncpa [#allocation9], 0 }
   0x7   :  { %19 = vsyncpa [#allocation12], 0  ;;  %s4554_s24 = smov 0   ;;  %s4556_s25 = smov 0  }
   0x8   :  { %s4558_s26 = smov 0   ;;  %s4560_s27 = smov 0  }
   0x9 LB: > { %s5178_s2 = sld [smem:[#allocation19_spill]]  ;;  %s4578_s8 = sadd.s32 4294967295, %s4498_s27   ;;  %s4498_s27 = sphi %s4560_s27, %s5190_s27   ;;  %s4494_s26 = sphi %s4558_s26, %s5189_s26   ;;  %s4490_s25 = sphi %s4556_s25, %s5188_s25   ;;  %s4486_s24 = sphi %s4554_s24, %s5187_s24  }
   0xa   : > { %p2782_p0 = scmp.ge.s32.totalorder %s4498_s27, 1  ;;  %p46_p1 = scmp.eq.s32.totalorder %s4578_s8, 0 }
   0xb   : > { %p208_p2 = scmp.lt.s32.totalorder %s4498_s27, 4  ;;  %p2783_p3 = scmp.ne.s32.totalorder %s4578_s8, 0 }
   0xc   : > { %s4500_s10 = smov [#allocation7]   ;;  %s232_s14 = sshll.u32 %s5172_s3, 4  ;;  %s233_s14 = int_to_ptr.hbm [resolvable:$true] %s232_s14 }
   0xd   : > { %p4584_p4 = pnand %p2782_p0, %p208_p2  ;;  %s222_s11 = sshll.u32 %s4500_s10, 4  ;;  %s223_s11 = int_to_ptr.vmem [resolvable:$true] %s222_s11 }
   0xe   : > { %s4501_s16 = smov [#allocation8]   ;;  %s255_s20 = sshll.u32 %s5174_s5, 4  ;;  %s256_s20 = int_to_ptr.hbm [resolvable:$true] %s255_s20 }
   0xf   : > { %s220_s30 = sshll.u32 %s5178_s2, 4  ;;  %p4149_p5 = pneg %p4584_p4  ;;  %s221_s30 = int_to_ptr.hbm [resolvable:$true] %s220_s30 }
  0x10   : > { %s234_s17 = sshll.u32 %s4501_s16, 4  ;;  %s4502_s21 = smov [#allocation11]   ;;  %s235_s17 = int_to_ptr.vmem [resolvable:$true] %s234_s17 }
  0x11   : > { %p4595_p6 = pnand %p4149_p5, %p46_p1  ;;  %s257_s22 = sshll.u32 %s4502_s21, 4  ;;  %s258_s22 = int_to_ptr.vmem [resolvable:$true] %s257_s22 }
  0x12   : > { %s244_s29 = sshll.u32 %s5173_s4, 4  ;;  %s4503_s10 = smov 192   ;;  %s245_s29 = int_to_ptr.hbm [resolvable:$true] %s244_s29 }
  0x13   : > { %4152 = dma.hbm_to_vmem [thread:$0]  (!%p4595_p6), %s221_s30, 64, %s223_s11, [#allocation6]  }
  0x14   : > { %4155 = dma.hbm_to_vmem [thread:$0]  (!%p4595_p6), %s233_s14, 64, %s235_s17, [#allocation9]  }
  0x15   : > { %s4504_s12 = smov 12   ;;  %s4505_s30 = smov [#allocation10]  }
  0x16   : > { %4161 = dma.hbm_to_vmem [thread:$0]  (!%p4595_p6), %s256_s20, 12288, %s258_s22, [#allocation12], %s4503_s10, %s4503_s10, %s4504_s12  }
  0x17   : > { %s246_s11 = sshll.u32 %s4505_s30, 4  ;;  %s270_s16 = sshll.u32 %s5175_s6, 4  ;;  %s247_s11 = int_to_ptr.vmem [resolvable:$true] %s246_s11  ;;  %s271_s16 = int_to_ptr.hbm [resolvable:$true] %s270_s16 }
  0x18   : > { %4158 = dma.hbm_to_vmem [thread:$0]  (!%p4595_p6), %s245_s29, 16, %s247_s11, [#allocation9]  }
  0x19   : > { %s4506_s17 = smov [#allocation13]   ;;  %s4619_s19 = sadd.s32 1, %s4498_s27  }
  0x1a   : > { %s272_s18 = sshll.u32 %s4506_s17, 4  ;;  %s29_s20 = ssub.s32 %s4498_s27, %s4619_s19  ;;  %s273_s18 = int_to_ptr.vmem [resolvable:$true] %s272_s18 }
  0x1b   : > { %4164 = dma.hbm_to_vmem [thread:$0]  (!%p4595_p6), %s271_s16, 48, %s273_s18, [#allocation12]  }
  0x1c   : > { %s32_s21 = sadd.s32 1, %s4494_s26  ;;  %p30_p7 = scmp.eq.s32.totalorder %s29_s20, 0 }
  0x1d   : > { %p39_p8 = scmp.ne.s32.totalorder %s4494_s26, %s4490_s25  ;;  %p40_p9 = scmp.eq.s32.totalorder %s4498_s27, 0 }
  0x1e   : > { %p45_p10 = scmp.ne.s32.totalorder %s4490_s25, %s4486_s24  ;;  %p4177_p13 = scmp.lt.s32.totalorder %s4498_s27, 3 }
  0x1f   : > { %s4630_s22 = scalar_select %p30_p7, %s4494_s26, %s32_s21  }
  0x20   : > { %p41_p11 = por %p40_p9, %p39_p8  ;;  %p4634_p12 = por %p46_p1, %p45_p10 }
  0x21   : > { %s283_s15 = sand.u32 1, %s4494_s26   ;;  %s3861_s29 = smul.u32 10, %s4498_s27 }
  0x22   : > { %s4121_s28 = smul.u32 10, %s283_s15  ;;  %p4641_p0 = pnand %p4177_p13, %p41_p11 }
  0x23   : > { %s4122_s12 = smul.u32 1280, %s283_s15  ;;  %s292_s11 = scalar_lea.hbm %s5169_s0, %s3861_s29 }
  0x24   : > { %s287_s13 = scalar_lea.vmem [#allocation3], %s4121_s28  ;;  %s294_s16 = sshll.u32 %s292_s11, 4  ;;  %s295_s16 = int_to_ptr.hbm [resolvable:$true] %s294_s16 }
  0x25   : > { %s296_s14 = sshll.u32 %s287_s13, 4  ;;  %s284_s17 = scalar_lea.sflag [#allocation4], %s283_s15  ;;  %s297_s14 = int_to_ptr.vmem [resolvable:$true] %s296_s14 }
  0x26   : > { %s4388_s18 = sshra.s32 %s295_s16, 4  ;;  %p4392_p5 = pneg %p4641_p0  ;;  %s4389_s18 = int_to_ptr.hbm [resolvable:$true] %s4388_s18 }
  0x27   : > { %s4390_s20 = scalar_lea.hbm %s4389_s18, 10  ;;  %s4395_s29 = scalar_lea.hbm %s5169_s0, 30 }
  0x28   : > { %p4391_p2 = scmp.ne.s32.totalorder %s4389_s18, %s4390_s20  ;;  %p4396_p8 = scmp.lt.s32.totalorder %s4389_s18, %s5169_s0 }
  0x29   : > { %p4397_p9 = scmp.lt.s32.totalorder %s4395_s29, %s4390_s20 }
  0x2a   : > { %p4393_p6 = pnand %p4392_p5, %p4391_p2 }
  0x2b   : > { %p4398_p10 = por %p4397_p9, %p4396_p8 }
  0x2c   : > { %p4394_p7 = pneg %p4393_p6 }
  0x2e   : > { %p4399_p11 = pnand %p4398_p10, %p4394_p7 }
  0x30   : > { %4402 = shalt.err (!%p4399_p11)
}
  0x31   : > { %4168 = dma.hbm_to_vmem [thread:$0]  (!%p4641_p0), %s295_s16, 160, %s297_s14, %s284_s17  }
  0x32   : > { %s303_s15 = sand.u32 1, %s4498_s27   ;;  %s307_s30 = scalar_lea.vmem [#allocation5], %s4122_s12 }
  0x33   : > { %s316_s11 = sshll.u32 %s307_s30, 4  ;;  %s4120_s13 = smul.u32 1280, %s4498_s27  ;;  %s317_s11 = int_to_ptr.vmem [resolvable:$true] %s316_s11 }
  0x34   : > { %s304_s20 = scalar_lea.sflag [#allocation6], %s303_s15  ;;  %s4425_s27 = scalar_lea.hbm %s5170_s1, 3840 }
  0x35   : > { %s313_s28 = scalar_lea.hbm %s5170_s1, %s4120_s13 }
  0x36   : > { %s314_s18 = sshll.u32 %s313_s28, 4  ;;  %s315_s18 = int_to_ptr.hbm [resolvable:$true] %s314_s18 }
  0x37   : > { %s4418_s29 = sshra.s32 %s315_s18, 4  ;;  %s4419_s29 = int_to_ptr.hbm [resolvable:$true] %s4418_s29 }
  0x38   : > { %s4420_s24 = scalar_lea.hbm %s4419_s29, 1280  ;;  %p4426_p7 = scmp.lt.s32.totalorder %s4419_s29, %s5170_s1 }
  0x39   : > { %p4421_p13 = scmp.ne.s32.totalorder %s4419_s29, %s4420_s24  ;;  %p4427_p8 = scmp.lt.s32.totalorder %s4425_s27, %s4420_s24 }
  0x3b   : > { %p4423_p2 = pnand %p4421_p13, %p4392_p5  ;;  %p4428_p9 = por %p4427_p8, %p4426_p7 }
  0x3d   : > { %p4424_p6 = pneg %p4423_p2 }
  0x3f   : > { %p4429_p10 = pnand %p4428_p9, %p4424_p6 }
  0x41   : > { %4432 = shalt.err (!%p4429_p10)
}
  0x42   : > { %s4507_s15 = smov 256   ;;  %s4508_s30 = smov 16  }
  0x43   : > { %4171 = dma.hbm_to_vmem [thread:$0]  (!%p4641_p0), %s315_s18, 20480, %s317_s11, %s304_s20, %s4507_s15, %s4507_s15, %s4508_s30  }
  0x44   : > { %328 = sbr.rel (%p4584_p4) target bundleno = 1019 (0x3fb), region = 48  ;;  %s330_s13 = sand.u32 (!%p4584_p4), 1, %s4490_s25  }
  0x45   : > { %s4123_s2 = smul.u32 (!%p4584_p4), 10, %s330_s13  ;;  %s331_s21 = scalar_lea.sflag (!%p4584_p4), [#allocation4], %s330_s13 }
  0x47   : > { %s4680_s28 = scalar_lea.vmem (!%p4584_p4), [#allocation3], %s4123_s2 }
  0x49   : > { %4465 = dma.done.wait (%p4634_p12), %s331_s21, 160  }
  0x4a   : > { %4467 = vsyncadd (%p4634_p12), %s331_s21, 4294967136  ;;  %s340_s29 = sand.u32 1, %s4578_s8   ;;  %s4124_s10 = smul.u32 1280, %s330_s13 }
  0x4b   : > { %s341_s11 = scalar_lea.sflag [#allocation6], %s340_s29 }
  0x4c   : > { %s4687_s18 = scalar_lea.vmem [#allocation5], %s4124_s10 }
  0x4d   : > { %4469 = dma.done.wait (%p4634_p12), %s341_s11, 20480  }
  0x4e   : > { %4471 = vsyncadd (%p4634_p12), %s341_s11, 4294946816 }
  0x4f   : > { %4473 = dma.done.wait (%p46_p1), [#allocation6], 64  }
  0x50   : > { %4475 = vsyncadd (%p46_p1), [#allocation6], 4294967232 }
  0x51   : > { %4477 = dma.done.wait (%p46_p1), [#allocation9], 80  }
  0x52   : > { %4479 = vsyncadd (%p46_p1), [#allocation9], 4294967216 }
  0x53   : > { %4481 = dma.done.wait (%p46_p1), [#allocation12], 12336  }
  0x54   : > { %4483 = vsyncadd (%p46_p1), [#allocation12], 4294954960  ;;  %406 = sbr.rel (%p2783_p3) target bundleno = 91 (0x5b), region = 80 }
  0x59   : > { %v4509_v0 = vmov 0.0  }
  0x5a   : > { %407 = vst [vmem:[#allocation2] sm:$0xff] %v4509_v0 }
  0x5b PF: > { %v2913_v1 = vld [vmem:[%s4687_s18 + $0xe0] sm:$0xf]  ;;  %v3894_v2 = vld [vmem:[%s4687_s18 + $0xec] sm:$0xf0]  ;;  %vm1658_vm0 = vcmask 1041408   ;;  %vm1660_vm1 = vcmask 1045508  }
  0x5c   : > { %v3041_v3 = vld [vmem:[%s4687_s18 + $0x1e0] sm:$0xf]  ;;  %v2914_v4 = vor.u32 %v3894_v2, %v2913_v1  ;;  %v3926_v5 = vld [vmem:[%s4687_s18 + $0x1ec] sm:$0xf0]  ;;  %vm1662_vm2 = vcmask 1043456   ;;  %p3439_p1 = scmp.ne.s32.totalorder %s4578_s8, 2 }
  0x5d   : > { %v3169_v6 = vld [vmem:[%s4687_s18 + $0x2e0] sm:$0xf]  ;;  %v3958_v7 = vld [vmem:[%s4687_s18 + $0x2ec] sm:$0xf0]  ;;  %v3042_v8 = vor.u32 %v3926_v5, %v3041_v3 }
  0x5e   : > { %v3170_v9 = vor.u32 %v3958_v7, %v3169_v6  ;;  %v3297_v10 = vld [vmem:[%s4687_s18 + $0x3e0] sm:$0xf]  ;;  %v3990_v11 = vld [vmem:[%s4687_s18 + $0x3ec] sm:$0xf0]  ;;  %1391 = vmatpush.bf16.msra.mxu0 %v2914_v4 }
  0x5f   : > { %v2897_v12 = vld [vmem:[%s4687_s18 + $0xc0] sm:$0xf]  ;;  %v3298_v13 = vor.u32 %v3990_v11, %v3297_v10  ;;  %v3890_v14 = vld [vmem:[%s4687_s18 + $0xcc] sm:$0xf0]  ;;  %1404 = vmatpush.bf16.msra.mxu1 %v3042_v8 }
  0x60   : > { %v3025_v15 = vld [vmem:[%s4687_s18 + $0x1c0] sm:$0xf]  ;;  %v3922_v16 = vld [vmem:[%s4687_s18 + $0x1cc] sm:$0xf0]  ;;  %1417 = vmatpush.bf16.msra.mxu2 %v3170_v9  ;;  %v2898_v17 = vor.u32 %v3890_v14, %v2897_v12 }
  0x61   : > { %v3026_v18 = vor.u32 %v3922_v16, %v3025_v15  ;;  %v3153_v19 = vld [vmem:[%s4687_s18 + $0x2c0] sm:$0xf]  ;;  %v3954_v20 = vld [vmem:[%s4687_s18 + $0x2cc] sm:$0xf0]  ;;  %1430 = vmatpush.bf16.msra.mxu3 %v3298_v13 }
  0x62   : > { %v3281_v21 = vld [vmem:[%s4687_s18 + $0x3c0] sm:$0xf]  ;;  %v3154_v22 = vor.u32 %v3954_v20, %v3153_v19  ;;  %v3986_v23 = vld [vmem:[%s4687_s18 + $0x3cc] sm:$0xf0]  ;;  %1392 = vmatpush.bf16.msra.mxu0 %v2898_v17 }
  0x63   : > { %v2881_v24 = vld [vmem:[%s4687_s18 + $0xa0] sm:$0xf]  ;;  %v3886_v25 = vld [vmem:[%s4687_s18 + $0xac] sm:$0xf0]  ;;  %v3282_v26 = vor.u32 %v3986_v23, %v3281_v21  ;;  %1405 = vmatpush.bf16.msra.mxu1 %v3026_v18 }
  0x64   : > { %v3009_v27 = vld [vmem:[%s4687_s18 + $0x1a0] sm:$0xf]  ;;  %v3918_v28 = vld [vmem:[%s4687_s18 + $0x1ac] sm:$0xf0]  ;;  %v2882_v30 = vor.u32 %v3886_v25, %v2881_v24  ;;  %1418 = vmatpush.bf16.msra.mxu2 %v3154_v22 }
  0x65   : > { %v3137_v29 = vld [vmem:[%s4687_s18 + $0x2a0] sm:$0xf]  ;;  %v3950_v31 = vld [vmem:[%s4687_s18 + $0x2ac] sm:$0xf0]  ;;  %v3010_v34 = vor.u32 %v3918_v28, %v3009_v27  ;;  %1431 = vmatpush.bf16.msra.mxu3 %v3282_v26 }
  0x66   : > { %v3265_v32 = vld [vmem:[%s4687_s18 + $0x3a0] sm:$0xf]  ;;  %v3982_v33 = vld [vmem:[%s4687_s18 + $0x3ac] sm:$0xf0]  ;;  %v3138_v35 = vor.u32 %v3950_v31, %v3137_v29  ;;  %1393 = vmatpush.bf16.msra.mxu0 %v2882_v30  ;;  %v3892_v31 = vld [vmem:[%s4687_s18 + $0xe4] sm:$0xf] }
  0x67   : > { %v2865_v36 = vld [vmem:[%s4687_s18 + $0x80] sm:$0xf]  ;;  %v3882_v37 = vld [vmem:[%s4687_s18 + $0x8c] sm:$0xf0]  ;;  %v3266_v39 = vor.u32 %v3982_v33, %v3265_v32  ;;  %1406 = vmatpush.bf16.msra.mxu1 %v3010_v34  ;;  %v2915_v33 = vld [vmem:[%s4687_s18 + $0xf0] sm:$0xf0] }
  0x68   : > { %v2993_v38 = vld [vmem:[%s4687_s18 + $0x180] sm:$0xf]  ;;  %v3914_v40 = vld [vmem:[%s4687_s18 + $0x18c] sm:$0xf0]  ;;  %v2866_v45 = vor.u32 %v3882_v37, %v2865_v36  ;;  %1419 = vmatpush.bf16.msra.mxu2 %v3138_v35  ;;  %v3924_v34 = vld [vmem:[%s4687_s18 + $0x1e4] sm:$0xf] }
  0x69   : > { %v3121_v41 = vld [vmem:[%s4687_s18 + $0x280] sm:$0xf]  ;;  %v3946_v42 = vld [vmem:[%s4687_s18 + $0x28c] sm:$0xf0]  ;;  %v2994_v46 = vor.u32 %v3914_v40, %v2993_v38  ;;  %1432 = vmatpush.bf16.msra.mxu3 %v3266_v39  ;;  %v3043_v35 = vld [vmem:[%s4687_s18 + $0x1f0] sm:$0xf0] }
  0x6a   : > { %v3249_v43 = vld [vmem:[%s4687_s18 + $0x380] sm:$0xf]  ;;  %v3978_v44 = vld [vmem:[%s4687_s18 + $0x38c] sm:$0xf0]  ;;  %v3122_v47 = vor.u32 %v3946_v42, %v3121_v41  ;;  %1394 = vmatpush.bf16.msra.mxu0 %v2866_v45  ;;  %v3956_v38 = vld [vmem:[%s4687_s18 + $0x2e4] sm:$0xf]  ;;  %v2918_v42 = vor.u32 %v3892_v31, %v2915_v33 }
  0x6b   : > { %v2849_v48 = vld [vmem:[%s4687_s18 + $0x60] sm:$0xf]  ;;  %v3878_v49 = vld [vmem:[%s4687_s18 + $0x6c] sm:$0xf0]  ;;  %v3250_v51 = vor.u32 %v3978_v44, %v3249_v43  ;;  %1407 = vmatpush.bf16.msra.mxu1 %v2994_v46  ;;  %v3171_v39 = vld [vmem:[%s4687_s18 + $0x2f0] sm:$0xf0]  ;;  %v3046_v43 = vor.u32 %v3924_v34, %v3043_v35 }
  0x6c   : > { %v2977_v50 = vld [vmem:[%s4687_s18 + $0x160] sm:$0xf]  ;;  %v3910_v52 = vld [vmem:[%s4687_s18 + $0x16c] sm:$0xf0]  ;;  %v2850_v57 = vor.u32 %v3878_v49, %v2849_v48  ;;  %1420 = vmatpush.bf16.msra.mxu2 %v3122_v47  ;;  %v3888_v46 = vld [vmem:[%s4687_s18 + $0xc4] sm:$0xf]  ;;  %v3174_v47 = vor.u32 %v3956_v38, %v3171_v39 }
  0x6d   : > { %v3105_v53 = vld [vmem:[%s4687_s18 + $0x260] sm:$0xf]  ;;  %v3942_v54 = vld [vmem:[%s4687_s18 + $0x26c] sm:$0xf0]  ;;  %v2978_v58 = vor.u32 %v3910_v52, %v2977_v50  ;;  %1433 = vmatpush.bf16.msra.mxu3 %v3250_v51  ;;  %v2899_v48 = vld [vmem:[%s4687_s18 + $0xd0] sm:$0xf0] }
  0x6e   : > { %v3233_v55 = vld [vmem:[%s4687_s18 + $0x360] sm:$0xf]  ;;  %v3974_v56 = vld [vmem:[%s4687_s18 + $0x36c] sm:$0xf0]  ;;  %v3106_v59 = vor.u32 %v3942_v54, %v3105_v53  ;;  %1395 = vmatpush.bf16.msra.mxu0 %v2850_v57  ;;  %v3920_v49 = vld [vmem:[%s4687_s18 + $0x1c4] sm:$0xf]  ;;  %v2902_v54 = vor.u32 %v3888_v46, %v2899_v48 }
  0x6f   : > { %v2833_v60 = vld [vmem:[%s4687_s18 + $0x40] sm:$0xf]  ;;  %v3874_v61 = vld [vmem:[%s4687_s18 + $0x4c] sm:$0xf0]  ;;  %v3234_v63 = vor.u32 %v3974_v56, %v3233_v55  ;;  %1408 = vmatpush.bf16.msra.mxu1 %v2978_v58  ;;  %v3027_v50 = vld [vmem:[%s4687_s18 + $0x1d0] sm:$0xf0] }
  0x70   : > { %v2961_v62 = vld [vmem:[%s4687_s18 + $0x140] sm:$0xf]  ;;  %v3906_v0 = vld [vmem:[%s4687_s18 + $0x14c] sm:$0xf0]  ;;  %v2834_v5 = vor.u32 %v3874_v61, %v2833_v60  ;;  %1421 = vmatpush.bf16.msra.mxu2 %v3106_v59  ;;  %v3952_v51 = vld [vmem:[%s4687_s18 + $0x2c4] sm:$0xf]  ;;  %v3030_v55 = vor.u32 %v3920_v49, %v3027_v50 }
  0x71   : > { %v3089_v1 = vld [vmem:[%s4687_s18 + $0x240] sm:$0xf]  ;;  %v3938_v2 = vld [vmem:[%s4687_s18 + $0x24c] sm:$0xf0]  ;;  %v2962_v6 = vor.u32 %v3906_v0, %v2961_v62  ;;  %1434 = vmatpush.bf16.msra.mxu3 %v3234_v63  ;;  %v3155_v52 = vld [vmem:[%s4687_s18 + $0x2d0] sm:$0xf0] }
  0x72   : > { %v3217_v3 = vld [vmem:[%s4687_s18 + $0x340] sm:$0xf]  ;;  %v3970_v4 = vld [vmem:[%s4687_s18 + $0x34c] sm:$0xf0]  ;;  %v3090_v7 = vor.u32 %v3938_v2, %v3089_v1  ;;  %1396 = vmatpush.bf16.msra.mxu0 %v2834_v5  ;;  %v3884_v58 = vld [vmem:[%s4687_s18 + $0xa4] sm:$0xf]  ;;  %v3158_v59 = vor.u32 %v3952_v51, %v3155_v52 }
  0x73   : > { %v2817_v8 = vld [vmem:[%s4687_s18 + $0x20] sm:$0xf]  ;;  %v3870_v9 = vld [vmem:[%s4687_s18 + $0x2c] sm:$0xf0]  ;;  %v3218_v11 = vor.u32 %v3970_v4, %v3217_v3  ;;  %1409 = vmatpush.bf16.msra.mxu1 %v2962_v6  ;;  %v2883_v60 = vld [vmem:[%s4687_s18 + $0xb0] sm:$0xf0] }
  0x74   : > { %v2945_v10 = vld [vmem:[%s4687_s18 + $0x120] sm:$0xf]  ;;  %v3902_v12 = vld [vmem:[%s4687_s18 + $0x12c] sm:$0xf0]  ;;  %v2818_v17 = vor.u32 %v3870_v9, %v2817_v8  ;;  %1422 = vmatpush.bf16.msra.mxu2 %v3090_v7  ;;  %v3916_v61 = vld [vmem:[%s4687_s18 + $0x1a4] sm:$0xf]  ;;  %v2886_v4 = vor.u32 %v3884_v58, %v2883_v60 }
  0x75   : > { %v3073_v13 = vld [vmem:[%s4687_s18 + $0x220] sm:$0xf]  ;;  %v3934_v14 = vld [vmem:[%s4687_s18 + $0x22c] sm:$0xf0]  ;;  %v2946_v20 = vor.u32 %v3902_v12, %v2945_v10  ;;  %1435 = vmatpush.bf16.msra.mxu3 %v3218_v11  ;;  %v3011_v62 = vld [vmem:[%s4687_s18 + $0x1b0] sm:$0xf0] }
  0x76   : > { %v3201_v15 = vld [vmem:[%s4687_s18 + $0x320] sm:$0xf]  ;;  %v3966_v16 = vld [vmem:[%s4687_s18 + $0x32c] sm:$0xf0]  ;;  %v3074_v21 = vor.u32 %v3934_v14, %v3073_v13  ;;  %1397 = vmatpush.bf16.msra.mxu0 %v2818_v17  ;;  %v3948_v63 = vld [vmem:[%s4687_s18 + $0x2a4] sm:$0xf]  ;;  %v3014_v5 = vor.u32 %v3916_v61, %v3011_v62 }
  0x77   : > { %v2801_v18 = vld [vmem:[%s4687_s18] sm:$0xf]  ;;  %v3866_v19 = vld [vmem:[%s4687_s18 + $0xc] sm:$0xf0]  ;;  %v3202_v25 = vor.u32 %v3966_v16, %v3201_v15  ;;  %1410 = vmatpush.bf16.msra.mxu1 %v2946_v20  ;;  %v3139_v0 = vld [vmem:[%s4687_s18 + $0x2b0] sm:$0xf0] }
  0x78   : > { %v2929_v22 = vld [vmem:[%s4687_s18 + $0x100] sm:$0xf]  ;;  %v3898_v23 = vld [vmem:[%s4687_s18 + $0x10c] sm:$0xf0]  ;;  %v2802_v32 = vor.u32 %v3866_v19, %v2801_v18  ;;  %1423 = vmatpush.bf16.msra.mxu2 %v3074_v21  ;;  %v3880_v7 = vld [vmem:[%s4687_s18 + $0x84] sm:$0xf]  ;;  %v3142_v8 = vor.u32 %v3948_v63, %v3139_v0 }
  0x79   : > { %v3057_v24 = vld [vmem:[%s4687_s18 + $0x200] sm:$0xf]  ;;  %v3930_v26 = vld [vmem:[%s4687_s18 + $0x20c] sm:$0xf0]  ;;  %v2930_v36 = vor.u32 %v3898_v23, %v2929_v22  ;;  %1436 = vmatpush.bf16.msra.mxu3 %v3202_v25  ;;  %v2867_v9 = vld [vmem:[%s4687_s18 + $0x90] sm:$0xf0] }
  0x7a   : > { %v3185_v27 = vld [vmem:[%s4687_s18 + $0x300] sm:$0xf]  ;;  %v3962_v28 = vld [vmem:[%s4687_s18 + $0x30c] sm:$0xf0]  ;;  %v3058_v37 = vor.u32 %v3930_v26, %v3057_v24  ;;  %1398 = vmatpush.bf16.msra.mxu0 %v2802_v32  ;;  %v3912_v10 = vld [vmem:[%s4687_s18 + $0x184] sm:$0xf]  ;;  %v2870_v16 = vor.u32 %v3880_v7, %v2867_v9 }
  0x7b   : > { %v3425_v29 = vld [vmem:[%s4687_s18 + $0x4e0] sm:$0xf]  ;;  %v4022_v30 = vld [vmem:[%s4687_s18 + $0x4ec] sm:$0xf0]  ;;  %v3186_v40 = vor.u32 %v3962_v28, %v3185_v27  ;;  %1411 = vmatpush.bf16.msra.mxu1 %v2930_v36  ;;  %v2995_v11 = vld [vmem:[%s4687_s18 + $0x190] sm:$0xf0] }
  0x7c   : > { %v3426_v41 = vor.u32 %v4022_v30, %v3425_v29  ;;  %v3409_v44 = vld [vmem:[%s4687_s18 + $0x4c0] sm:$0xf]  ;;  %v4018_v45 = vld [vmem:[%s4687_s18 + $0x4cc] sm:$0xf0]  ;;  %1424 = vmatpush.bf16.msra.mxu2 %v3058_v37  ;;  %v3944_v12 = vld [vmem:[%s4687_s18 + $0x284] sm:$0xf]  ;;  %v2998_v17 = vor.u32 %v3912_v10, %v2995_v11 }
  0x7d   : > { %1437 = vmatpush.bf16.msra.mxu3 %v3186_v40  ;;  %v3410_v53 = vor.u32 %v4018_v45, %v3409_v44  ;;  %v3393_v56 = vld [vmem:[%s4687_s18 + $0x4a0] sm:$0xf]  ;;  %v4014_v57 = vld [vmem:[%s4687_s18 + $0x4ac] sm:$0xf0]  ;;  %v3123_v13 = vld [vmem:[%s4687_s18 + $0x290] sm:$0xf0] }
  0x7e   : > { %1443 = vmatpush.bf16.msrb.mxu0 %v3426_v41  ;;  %v3394_v1 = vor.u32 %v4014_v57, %v3393_v56  ;;  %v3377_v2 = vld [vmem:[%s4687_s18 + $0x480] sm:$0xf]  ;;  %v409_v3 = vld [vmem:[%s4680_s28] sm:$0xff]  ;;  %v3876_v19 = vld [vmem:[%s4687_s18 + $0x64] sm:$0xf]  ;;  %v3126_v21 = vor.u32 %v3944_v12, %v3123_v13 }
  0x7f   : > { %1456 = vmatpush.bf16.msrb.mxu1 %v2918_v42  ;;  %v4010_v6 = vld [vmem:[%s4687_s18 + $0x48c] sm:$0xf0]  ;;  %413 = vst [vmem:[#allocation1] ss:$4 sm:$0xff] %v409_v3  ;;  %v3361_v15 = vld [vmem:[%s4687_s18 + $0x460] sm:$0xf] }
  0x80   : > { %1469 = vmatpush.bf16.msrb.mxu2 %v3046_v43  ;;  %v3378_v14 = vor.u32 %v4010_v6, %v3377_v2  ;;  %v4006_v18 = vld [vmem:[%s4687_s18 + $0x46c] sm:$0xf0]  ;;  %v2851_v20 = vld [vmem:[%s4687_s18 + $0x70] sm:$0xf0]  ;;  %v3908_v22 = vld [vmem:[%s4687_s18 + $0x164] sm:$0xf] }
  0x81   : > { %1482 = vmatpush.bf16.msrb.mxu3 %v3174_v47  ;;  %v2979_v23 = vld [vmem:[%s4687_s18 + $0x170] sm:$0xf0]  ;;  %v3940_v24 = vld [vmem:[%s4687_s18 + $0x264] sm:$0xf]  ;;  %v3345_v26 = vld [vmem:[%s4687_s18 + $0x440] sm:$0xf]  ;;  %v3362_v28 = vor.u32 %v4006_v18, %v3361_v15  ;;  %v2854_v29 = vor.u32 %v3876_v19, %v2851_v20 }
  0x82   : > { %1444 = vmatpush.bf16.msrb.mxu0 %v3410_v53  ;;  %v3107_v25 = vld [vmem:[%s4687_s18 + $0x270] sm:$0xf0]  ;;  %v4002_v27 = vld [vmem:[%s4687_s18 + $0x44c] sm:$0xf0]  ;;  %v3872_v30 = vld [vmem:[%s4687_s18 + $0x44] sm:$0xf]  ;;  %v2982_v33 = vor.u32 %v3908_v22, %v2979_v23 }
  0x83   : > { %1457 = vmatpush.bf16.msrb.mxu1 %v2902_v54  ;;  %v3110_v38 = vor.u32 %v3940_v24, %v3107_v25  ;;  %v2835_v39 = vld [vmem:[%s4687_s18 + $0x50] sm:$0xf0]  ;;  %v3904_v40 = vld [vmem:[%s4687_s18 + $0x144] sm:$0xf]  ;;  %v3346_v46 = vor.u32 %v4002_v27, %v3345_v26  ;;  %v3329_v47 = vld [vmem:[%s4687_s18 + $0x420] sm:$0xf] }
  0x84   : > { %1470 = vmatpush.bf16.msrb.mxu2 %v3030_v55  ;;  %v2963_v41 = vld [vmem:[%s4687_s18 + $0x150] sm:$0xf0]  ;;  %v3936_v44 = vld [vmem:[%s4687_s18 + $0x244] sm:$0xf]  ;;  %v3998_v48 = vld [vmem:[%s4687_s18 + $0x42c] sm:$0xf0]  ;;  %v2838_v49 = vor.u32 %v3872_v30, %v2835_v39 }
  0x85   : > { %1483 = vmatpush.bf16.msrb.mxu3 %v3158_v59  ;;  %v3091_v45 = vld [vmem:[%s4687_s18 + $0x250] sm:$0xf0]  ;;  %v2966_v50 = vor.u32 %v3904_v40, %v2963_v41  ;;  %v3868_v51 = vld [vmem:[%s4687_s18 + $0x24] sm:$0xf]  ;;  %v3330_v59 = vor.u32 %v3998_v48, %v3329_v47  ;;  %v3313_v60 = vld [vmem:[%s4687_s18 + $0x400] sm:$0xf] }
  0x86   : > { %1445 = vmatpush.bf16.msrb.mxu0 %v3394_v1  ;;  %v416_v31 = vld.sshfl [vmem:[#allocation1] sm:$0xff pattern:$0x73625140]  ;;  %v418_v32 = vld.sshfl [vmem:[#allocation1 + $0x10] sm:$0xff pattern:$0x73625140]  ;;  %v3094_v54 = vor.u32 %v3936_v44, %v3091_v45 }
  0x87   : > { %1458 = vmatpush.bf16.msrb.mxu1 %v2886_v4  ;;  %v4815_v34 = vpack.c.bf16 %v416_v31, %v416_v31  ;;  %v4817_v35 = vpack.c.bf16 %v418_v32, %v418_v32  ;;  %v419_v36 = vld.sshfl [vmem:[#allocation1 + $0x18] sm:$0xff pattern:$0x73625140]  ;;  %v417_v37 = vld.sshfl [vmem:[#allocation1 + $0x8] sm:$0xff pattern:$0x73625140] }
  0x88   : > { %1471 = vmatpush.bf16.msrb.mxu2 %v3014_v5  ;;  %v4822_v42 = vpack.c.bf16 %v419_v36, %v419_v36  ;;  %v4824_v43 = vpack.c.bf16 %v417_v37, %v417_v37  ;;  %v2819_v52 = vld [vmem:[%s4687_s18 + $0x30] sm:$0xf0]  ;;  %v3900_v55 = vld [vmem:[%s4687_s18 + $0x124] sm:$0xf]  ;;  %v3994_v61 = vld [vmem:[%s4687_s18 + $0x40c] sm:$0xf0] }
  0x89   : > { %1484 = vmatpush.bf16.msrb.mxu3 %v3142_v8  ;;  %1399 = vmatmul.bf16.vlgmr.msra.gmra.mxu0 %v4815_v34  ;;  %v410_v53 = vld [vmem:[%s4680_s28 + $0x8] sm:$0x3]  ;;  %v3932_v57 = vld [vmem:[%s4687_s18 + $0x224] sm:$0xf]  ;;  %v2822_v63 = vor.u32 %v3868_v51, %v2819_v52  ;;  %v3314_v11 = vor.u32 %v3994_v61, %v3313_v60  ;;  %v2921_v12 = vld [vmem:[%s4687_s18 + $0xe8] sm:$0xf] }
  0x8a   : > { %1446 = vmatpush.bf16.msrb.mxu0 %v3378_v14  ;;  %1425 = vmatmul.bf16.vlgmr.msra.gmra.mxu2 %v4817_v35  ;;  %v2947_v56 = vld [vmem:[%s4687_s18 + $0x130] sm:$0xf0]  ;;  %415 = vst [vmem:[#allocation1 + $0x20] ss:$4 sm:$0xff] %v410_v53  ;;  %v3864_v62 = vld [vmem:[%s4687_s18 + $0x4] sm:$0xf] }
  0x8b   : > { %1459 = vmatpush.bf16.msrb.mxu1 %v2870_v16  ;;  %1438 = vmatmul.bf16.vlgmr.msra.gmra.mxu3 %v4822_v42  ;;  %v3075_v58 = vld [vmem:[%s4687_s18 + $0x230] sm:$0xf0]  ;;  %v2950_v0 = vor.u32 %v3900_v55, %v2947_v56  ;;  %v3896_v2 = vld [vmem:[%s4687_s18 + $0x104] sm:$0xf]  ;;  %v3895_v13 = vld [vmem:[%s4687_s18 + $0xf4] sm:$0xf0] }
  0x8c   : > { %1472 = vmatpush.bf16.msrb.mxu2 %v2998_v17  ;;  %1412 = vmatmul.bf16.vlgmr.msra.gmra.mxu1 %v4824_v43  ;;  %v2803_v1 = vld [vmem:[%s4687_s18 + $0x10] sm:$0xf0]  ;;  %v3078_v4 = vor.u32 %v3932_v57, %v3075_v58  ;;  %v3928_v5 = vld [vmem:[%s4687_s18 + $0x204] sm:$0xf]  ;;  %v3049_v14 = vld [vmem:[%s4687_s18 + $0x1e8] sm:$0xf]  ;;  %v2922_v22 = vor.u32 %v3895_v13, %v2921_v12 }
  0x8d   : > { %1485 = vmatpush.bf16.msrb.mxu3 %v3126_v21  ;;  %v2931_v3 = vld [vmem:[%s4687_s18 + $0x110] sm:$0xf0]  ;;  %v3988_v7 = vld [vmem:[%s4687_s18 + $0x3e4] sm:$0xf]  ;;  %v2806_v15 = vor.u32 %v3864_v62, %v2803_v1  ;;  %v3927_v17 = vld [vmem:[%s4687_s18 + $0x1f4] sm:$0xf0] }
  0x8e   : > { %1447 = vmatpush.bf16.msrb.mxu0 %v3362_v28  ;;  %v3059_v6 = vld [vmem:[%s4687_s18 + $0x210] sm:$0xf0]  ;;  %v4020_v9 = vld [vmem:[%s4687_s18 + $0x4e4] sm:$0xf]  ;;  %v2934_v16 = vor.u32 %v3896_v2, %v2931_v3  ;;  %v3050_v26 = vor.u32 %v3927_v17, %v3049_v14  ;;  %v2905_v28 = vld [vmem:[%s4687_s18 + $0xc8] sm:$0xf] }
  0x8f   : > { %1460 = vmatpush.bf16.msrb.mxu1 %v2854_v29  ;;  %v3299_v8 = vld [vmem:[%s4687_s18 + $0x3f0] sm:$0xf0]  ;;  %v3062_v19 = vor.u32 %v3928_v5, %v3059_v6  ;;  %v3984_v23 = vld [vmem:[%s4687_s18 + $0x3c4] sm:$0xf]  ;;  %v3891_v29 = vld [vmem:[%s4687_s18 + $0xd4] sm:$0xf0] }
  0x90   : > { %1473 = vmatpush.bf16.msrb.mxu2 %v2982_v33  ;;  %v3427_v10 = vld [vmem:[%s4687_s18 + $0x4f0] sm:$0xf0]  ;;  %v3302_v20 = vor.u32 %v3988_v7, %v3299_v8  ;;  %v4016_v25 = vld [vmem:[%s4687_s18 + $0x4c4] sm:$0xf]  ;;  %v3033_v31 = vld [vmem:[%s4687_s18 + $0x1c8] sm:$0xf]  ;;  %v2906_v37 = vor.u32 %v3891_v29, %v2905_v28 }
  0x91   : > { %1486 = vmatpush.bf16.msrb.mxu3 %v3110_v38  ;;  %v420_v18 = vld.sshfl [vmem:[#allocation1 + $0x20] sm:$0xff pattern:$0x73625140]  ;;  %v3430_v21 = vor.u32 %v4020_v9, %v3427_v10  ;;  %v3283_v24 = vld [vmem:[%s4687_s18 + $0x3d0] sm:$0xf0] }
  0x92   : > { %1448 = vmatpush.bf16.msrb.mxu0 %v3346_v46  ;;  %v3411_v27 = vld [vmem:[%s4687_s18 + $0x4d0] sm:$0xf0]  ;;  %v4863_v30 = vpack.c.bf16 %v420_v18, %v420_v18  ;;  %v3923_v32 = vld [vmem:[%s4687_s18 + $0x1d4] sm:$0xf0]  ;;  %v3286_v33 = vor.u32 %v3984_v23, %v3283_v24  ;;  %v3980_v38 = vld [vmem:[%s4687_s18 + $0x3a4] sm:$0xf] }
  0x93   : > { %1461 = vmatpush.bf16.msrb.mxu1 %v2838_v49  ;;  %v3414_v36 = vor.u32 %v4016_v25, %v3411_v27  ;;  %v3267_v39 = vld [vmem:[%s4687_s18 + $0x3b0] sm:$0xf0]  ;;  %v4012_v40 = vld [vmem:[%s4687_s18 + $0x4a4] sm:$0xf]  ;;  %v3034_v41 = vor.u32 %v3923_v32, %v3033_v31  ;;  %v2889_v45 = vld [vmem:[%s4687_s18 + $0xa8] sm:$0xf] }
  0x94   : > { %1474 = vmatpush.bf16.msrb.mxu2 %v2966_v50  ;;  %v3395_v44 = vld [vmem:[%s4687_s18 + $0x4b0] sm:$0xf0]  ;;  %v3887_v46 = vld [vmem:[%s4687_s18 + $0xb4] sm:$0xf0]  ;;  %v3017_v47 = vld [vmem:[%s4687_s18 + $0x1a8] sm:$0xf]  ;;  %v3270_v49 = vor.u32 %v3980_v38, %v3267_v39 }
  0x95   : > { %1487 = vmatpush.bf16.msrb.mxu3 %v3094_v54  ;;  %v3919_v48 = vld [vmem:[%s4687_s18 + $0x1b4] sm:$0xf0]  ;;  %v3398_v50 = vor.u32 %v4012_v40, %v3395_v44  ;;  %v2890_v51 = vor.u32 %v3887_v46, %v2889_v45  ;;  %v3976_v52 = vld [vmem:[%s4687_s18 + $0x384] sm:$0xf]  ;;  %v3251_v53 = vld [vmem:[%s4687_s18 + $0x390] sm:$0xf0] }
  0x96   : > { %1449 = vmatpush.bf16.msrb.mxu0 %v3330_v59  ;;  %v4008_v54 = vld [vmem:[%s4687_s18 + $0x484] sm:$0xf]  ;;  %v3018_v55 = vor.u32 %v3919_v48, %v3017_v47  ;;  %v3379_v56 = vld [vmem:[%s4687_s18 + $0x490] sm:$0xf0]  ;;  %v2873_v57 = vld [vmem:[%s4687_s18 + $0x88] sm:$0xf]  ;;  %v3254_v61 = vor.u32 %v3976_v52, %v3251_v53 }
  0x97   : > { %1462 = vmatpush.bf16.msrb.mxu1 %v2822_v63  ;;  %v3883_v58 = vld [vmem:[%s4687_s18 + $0x94] sm:$0xf0]  ;;  %v3001_v59 = vld [vmem:[%s4687_s18 + $0x188] sm:$0xf]  ;;  %v3382_v62 = vor.u32 %v4008_v54, %v3379_v56  ;;  %v3235_v1 = vld [vmem:[%s4687_s18 + $0x370] sm:$0xf0] }
  0x98   : > { %1475 = vmatpush.bf16.msrb.mxu2 %v2950_v0  ;;  %v3915_v60 = vld [vmem:[%s4687_s18 + $0x194] sm:$0xf0]  ;;  %v2874_v63 = vor.u32 %v3883_v58, %v2873_v57  ;;  %v3972_v0 = vld [vmem:[%s4687_s18 + $0x364] sm:$0xf]  ;;  %v2857_v5 = vld [vmem:[%s4687_s18 + $0x68] sm:$0xf] }
  0x99   : > { %1488 = vmatpush.bf16.msrb.mxu3 %v3078_v4  ;;  %v4004_v2 = vld [vmem:[%s4687_s18 + $0x464] sm:$0xf]  ;;  %v3002_v3 = vor.u32 %v3915_v60, %v3001_v59  ;;  %v3363_v4 = vld [vmem:[%s4687_s18 + $0x470] sm:$0xf0]  ;;  %v3879_v6 = vld [vmem:[%s4687_s18 + $0x74] sm:$0xf0]  ;;  %v3238_v9 = vor.u32 %v3972_v0, %v3235_v1 }
  0x9a   : > { %1450 = vmatpush.bf16.msrb.mxu0 %v3314_v11  ;;  %v2985_v7 = vld [vmem:[%s4687_s18 + $0x168] sm:$0xf]  ;;  %v3911_v8 = vld [vmem:[%s4687_s18 + $0x174] sm:$0xf0]  ;;  %v3366_v10 = vor.u32 %v4004_v2, %v3363_v4  ;;  %v2858_v11 = vor.u32 %v3879_v6, %v2857_v5  ;;  %v3968_v12 = vld [vmem:[%s4687_s18 + $0x344] sm:$0xf] }
  0x9b   : > { %1463 = vmatpush.bf16.msrb.mxu1 %v2806_v15  ;;  %v3219_v13 = vld [vmem:[%s4687_s18 + $0x350] sm:$0xf0]  ;;  %v4000_v14 = vld [vmem:[%s4687_s18 + $0x444] sm:$0xf]  ;;  %v2986_v15 = vor.u32 %v3911_v8, %v2985_v7  ;;  %v2841_v17 = vld [vmem:[%s4687_s18 + $0x48] sm:$0xf] }
  0x9c   : > { %1476 = vmatpush.bf16.msrb.mxu2 %v2934_v16  ;;  %v3347_v16 = vld [vmem:[%s4687_s18 + $0x450] sm:$0xf0]  ;;  %v3875_v18 = vld [vmem:[%s4687_s18 + $0x54] sm:$0xf0]  ;;  %v3964_v24 = vld [vmem:[%s4687_s18 + $0x324] sm:$0xf] }
  0x9d   : > { %1489 = vmatpush.bf16.msrb.mxu3 %v3062_v19  ;;  %1451 = vmatmul.bf16.vlgmr.msrb.gmra.mxu0 %v4863_v30  ;;  %v2969_v19 = vld [vmem:[%s4687_s18 + $0x148] sm:$0xf]  ;;  %v2842_v23 = vor.u32 %v3875_v18, %v2841_v17  ;;  %v3203_v25 = vld [vmem:[%s4687_s18 + $0x330] sm:$0xf0]  ;;  %v3871_v31 = vld [vmem:[%s4687_s18 + $0x34] sm:$0xf0] }
  0x9e   : > { %1495 = vmatpush.bf16.msra.mxu0 %v3302_v20  ;;  %1464 = vmatmul.bf16.vlgmr.msrb.gmra.mxu1 %v4815_v34  ;;  %v3907_v20 = vld [vmem:[%s4687_s18 + $0x154] sm:$0xf0]  ;;  %v3331_v28 = vld [vmem:[%s4687_s18 + $0x430] sm:$0xf0]  ;;  %v2825_v29 = vld [vmem:[%s4687_s18 + $0x28] sm:$0xf] }
  0x9f   : > { %1508 = vmatpush.bf16.msra.mxu1 %v3430_v21  ;;  %1477 = vmatmul.bf16.vlgmr.msrb.gmra.mxu2 %v4824_v43  ;;  %v3222_v21 = vor.u32 %v3968_v12, %v3219_v13  ;;  %v2970_v27 = vor.u32 %v3907_v20, %v2969_v19  ;;  %v2953_v32 = vld [vmem:[%s4687_s18 + $0x128] sm:$0xf]  ;;  %v3187_v38 = vld [vmem:[%s4687_s18 + $0x310] sm:$0xf0]  ;;  %v2826_v40 = vor.u32 %v3871_v31, %v2825_v29  ;;  %v3867_v47 = vld [vmem:[%s4687_s18 + $0x14] sm:$0xf0] }
  0xa0   : > { %1521 = vmatpush.bf16.msra.mxu2 %v2922_v22  ;;  %1490 = vmatmul.bf16.vlgmr.msrb.gmra.mxu3 %v4817_v35  ;;  %v3350_v22 = vor.u32 %v4000_v14, %v3347_v16  ;;  %v3315_v44 = vld [vmem:[%s4687_s18 + $0x410] sm:$0xf0]  ;;  %v2809_v45 = vld [vmem:[%s4687_s18 + $0x8] sm:$0xf]  ;;  %v3991_v54 = vld [vmem:[%s4687_s18 + $0x3f4] sm:$0xf0] }
  0xa1   : > { %1534 = vmatpush.bf16.msra.mxu3 %v3050_v26  ;;  %v3996_v26 = vld [vmem:[%s4687_s18 + $0x424] sm:$0xf]  ;;  %v2937_v48 = vld [vmem:[%s4687_s18 + $0x108] sm:$0xf]  ;;  %v4023_v56 = vld [vmem:[%s4687_s18 + $0x4f4] sm:$0xf0]  ;;  %v2810_v58 = vor.u32 %v3867_v47, %v2809_v45 }
  0xa2   : > { %1496 = vmatpush.bf16.msra.mxu0 %v3286_v33  ;;  %v3903_v33 = vld [vmem:[%s4687_s18 + $0x134] sm:$0xf0]  ;;  %v3334_v39 = vor.u32 %v3996_v26, %v3331_v28  ;;  %v3305_v52 = vld [vmem:[%s4687_s18 + $0x3e8] sm:$0xf]  ;;  %v3893_v59 = vld [vmem:[%s4687_s18 + $0xec] sm:$0xf] }
  0xa3   : > { %1509 = vmatpush.bf16.msra.mxu1 %v3414_v36  ;;  %v3206_v36 = vor.u32 %v3964_v24, %v3203_v25  ;;  %v2954_v46 = vor.u32 %v3903_v33, %v2953_v32  ;;  %v2923_v60 = vld [vmem:[%s4687_s18 + $0xf8] sm:$0xf0]  ;;  %v3161_v1 = vld [vmem:[%s4687_s18 + $0x2c8] sm:$0xf]  ;;  %v3955_v2 = vld [vmem:[%s4687_s18 + $0x2d4] sm:$0xf0] }
  0xa4   : > { %1522 = vmatpush.bf16.msra.mxu2 %v2906_v37  ;;  %v3960_v37 = vld [vmem:[%s4687_s18 + $0x304] sm:$0xf]  ;;  %v2926_v4 = vor.u32 %v3893_v59, %v2923_v60  ;;  %v3987_v5 = vld [vmem:[%s4687_s18 + $0x3d4] sm:$0xf0]  ;;  %v3417_v6 = vld [vmem:[%s4687_s18 + $0x4c8] sm:$0xf] }
  0xa5   : > { %1535 = vmatpush.bf16.msra.mxu3 %v3034_v41  ;;  %v3992_v41 = vld [vmem:[%s4687_s18 + $0x404] sm:$0xf]  ;;  %v3190_v53 = vor.u32 %v3960_v37, %v3187_v38  ;;  %v4019_v7 = vld [vmem:[%s4687_s18 + $0x4d4] sm:$0xf0]  ;;  %v3889_v8 = vld [vmem:[%s4687_s18 + $0xcc] sm:$0xf] }
  0xa6   : > { %1497 = vmatpush.bf16.msra.mxu0 %v3270_v49  ;;  %v3899_v49 = vld [vmem:[%s4687_s18 + $0x114] sm:$0xf0]  ;;  %v3318_v57 = vor.u32 %v3992_v41, %v3315_v44  ;;  %v3418_v12 = vor.u32 %v4019_v7, %v3417_v6  ;;  %v3145_v13 = vld [vmem:[%s4687_s18 + $0x2a8] sm:$0xf]  ;;  %v3885_v20 = vld [vmem:[%s4687_s18 + $0xac] sm:$0xf] }
  0xa7   : > { %1510 = vmatpush.bf16.msra.mxu1 %v3398_v50  ;;  %v3177_v50 = vld [vmem:[%s4687_s18 + $0x2e8] sm:$0xf]  ;;  %v3951_v14 = vld [vmem:[%s4687_s18 + $0x2b4] sm:$0xf0]  ;;  %v3881_v33 = vld [vmem:[%s4687_s18 + $0x8c] sm:$0xf] }
  0xa8   : > { %1523 = vmatpush.bf16.msra.mxu2 %v2890_v51  ;;  %v3959_v51 = vld [vmem:[%s4687_s18 + $0x2f4] sm:$0xf0]  ;;  %v3401_v18 = vld [vmem:[%s4687_s18 + $0x4a8] sm:$0xf] }
  0xa9   : > { %1536 = vmatpush.bf16.msra.mxu3 %v3018_v55  ;;  %v3433_v55 = vld [vmem:[%s4687_s18 + $0x4e8] sm:$0xf]  ;;  %v3983_v17 = vld [vmem:[%s4687_s18 + $0x3b4] sm:$0xf0] }
  0xaa   : > { %1498 = vmatpush.bf16.msra.mxu0 %v3254_v61  ;;  %v2938_v61 = vor.u32 %v3899_v49, %v2937_v48  ;;  %v3434_v0 = vor.u32 %v4023_v56, %v3433_v55  ;;  %v4015_v19 = vld [vmem:[%s4687_s18 + $0x4b4] sm:$0xf0]  ;;  %v3129_v25 = vld [vmem:[%s4687_s18 + $0x288] sm:$0xf]  ;;  %v3877_v49 = vld [vmem:[%s4687_s18 + $0x6c] sm:$0xf] }
  0xab   : > { %1511 = vmatpush.bf16.msra.mxu1 %v3382_v62  ;;  %v3178_v62 = vor.u32 %v3959_v51, %v3177_v50  ;;  %v3402_v24 = vor.u32 %v4015_v19, %v3401_v18  ;;  %v3947_v26 = vld [vmem:[%s4687_s18 + $0x294] sm:$0xf0]  ;;  %v3385_v31 = vld [vmem:[%s4687_s18 + $0x488] sm:$0xf]  ;;  %v2859_v50 = vld [vmem:[%s4687_s18 + $0x78] sm:$0xf0] }
  0xac   : > { %1524 = vmatpush.bf16.msra.mxu2 %v2874_v63  ;;  %v3306_v63 = vor.u32 %v3991_v54, %v3305_v52  ;;  %v3979_v29 = vld [vmem:[%s4687_s18 + $0x394] sm:$0xf0]  ;;  %v3130_v37 = vor.u32 %v3947_v26, %v3129_v25  ;;  %v3241_v44 = vld [vmem:[%s4687_s18 + $0x368] sm:$0xf]  ;;  %v3957_v25 = vld [vmem:[%s4687_s18 + $0x2ec] sm:$0xf] }
  0xad   : > { %1537 = vmatpush.bf16.msra.mxu3 %v3002_v3  ;;  %v3289_v3 = vld [vmem:[%s4687_s18 + $0x3c8] sm:$0xf]  ;;  %v4011_v32 = vld [vmem:[%s4687_s18 + $0x494] sm:$0xf0] }
  0xae   : > { %1499 = vmatpush.bf16.msra.mxu0 %v3238_v9  ;;  %v2907_v9 = vld [vmem:[%s4687_s18 + $0xd8] sm:$0xf0]  ;;  %v3943_v41 = vld [vmem:[%s4687_s18 + $0x274] sm:$0xf0]  ;;  %v3369_v47 = vld [vmem:[%s4687_s18 + $0x468] sm:$0xf] }
  0xaf   : > { %1512 = vmatpush.bf16.msra.mxu1 %v3366_v10  ;;  %v3162_v10 = vor.u32 %v3955_v2, %v3161_v1  ;;  %v2910_v16 = vor.u32 %v3889_v8, %v2907_v9  ;;  %v4007_v48 = vld [vmem:[%s4687_s18 + $0x474] sm:$0xf0]  ;;  %v3097_v54 = vld [vmem:[%s4687_s18 + $0x248] sm:$0xf]  ;;  %v3869_v9 = vld [vmem:[%s4687_s18 + $0x2c] sm:$0xf] }
  0xb0   : > { %1525 = vmatpush.bf16.msra.mxu2 %v2858_v11  ;;  %v3290_v11 = vor.u32 %v3987_v5, %v3289_v3  ;;  %v3939_v55 = vld [vmem:[%s4687_s18 + $0x254] sm:$0xf0]  ;;  %v3225_v56 = vld [vmem:[%s4687_s18 + $0x348] sm:$0xf] }
  0xb1   : > { %1538 = vmatpush.bf16.msra.mxu3 %v2986_v15  ;;  %v3273_v15 = vld [vmem:[%s4687_s18 + $0x3a8] sm:$0xf]  ;;  %v4003_v60 = vld [vmem:[%s4687_s18 + $0x454] sm:$0xf0] }
  0xb2   : > { %1500 = vmatpush.bf16.msra.mxu0 %v3222_v21  ;;  %v2891_v21 = vld [vmem:[%s4687_s18 + $0xb8] sm:$0xf0]  ;;  %v3353_v59 = vld [vmem:[%s4687_s18 + $0x448] sm:$0xf]  ;;  %v3935_v3 = vld [vmem:[%s4687_s18 + $0x234] sm:$0xf0] }
  0xb3   : > { %1513 = vmatpush.bf16.msra.mxu1 %v3350_v22  ;;  %v3146_v22 = vor.u32 %v3951_v14, %v3145_v13  ;;  %v2894_v28 = vor.u32 %v3885_v20, %v2891_v21  ;;  %v3354_v1 = vor.u32 %v4003_v60, %v3353_v59  ;;  %v3081_v2 = vld [vmem:[%s4687_s18 + $0x228] sm:$0xf]  ;;  %v3967_v6 = vld [vmem:[%s4687_s18 + $0x334] sm:$0xf0]  ;;  %v3865_v21 = vld [vmem:[%s4687_s18 + $0xc] sm:$0xf] }
  0xb4   : > { %1526 = vmatpush.bf16.msra.mxu2 %v2842_v23  ;;  %v3274_v23 = vor.u32 %v3983_v17, %v3273_v15  ;;  %v3337_v7 = vld [vmem:[%s4687_s18 + $0x428] sm:$0xf]  ;;  %v3999_v8 = vld [vmem:[%s4687_s18 + $0x434] sm:$0xf0]  ;;  %v3147_v59 = vld [vmem:[%s4687_s18 + $0x2b8] sm:$0xf0] }
  0xb5   : > { %1539 = vmatpush.bf16.msra.mxu3 %v2970_v27  ;;  %v3257_v27 = vld [vmem:[%s4687_s18 + $0x388] sm:$0xf]  ;;  %v3931_v13 = vld [vmem:[%s4687_s18 + $0x214] sm:$0xf0]  ;;  %v3338_v15 = vor.u32 %v3999_v8, %v3337_v7  ;;  %v3981_v60 = vld [vmem:[%s4687_s18 + $0x3ac] sm:$0xf] }
  0xb6   : > { %1501 = vmatpush.bf16.msra.mxu0 %v3206_v36  ;;  %v2875_v36 = vld [vmem:[%s4687_s18 + $0x98] sm:$0xf0]  ;;  %v3258_v38 = vor.u32 %v3979_v29, %v3257_v27  ;;  %v3963_v17 = vld [vmem:[%s4687_s18 + $0x314] sm:$0xf0]  ;;  %v3321_v18 = vld [vmem:[%s4687_s18 + $0x408] sm:$0xf] }
  0xb7   : > { %1514 = vmatpush.bf16.msra.mxu1 %v3334_v39  ;;  %v3386_v39 = vor.u32 %v4011_v32, %v3385_v31  ;;  %v2878_v45 = vor.u32 %v3881_v33, %v2875_v36  ;;  %v3995_v20 = vld [vmem:[%s4687_s18 + $0x414] sm:$0xf0]  ;;  %v3179_v27 = vld [vmem:[%s4687_s18 + $0x2f8] sm:$0xf0]  ;;  %v4021_v33 = vld [vmem:[%s4687_s18 + $0x4ec] sm:$0xf] }
  0xb8   : > { %1527 = vmatpush.bf16.msra.mxu2 %v2826_v40  ;;  %v3113_v40 = vld [vmem:[%s4687_s18 + $0x268] sm:$0xf]  ;;  %v3307_v29 = vld [vmem:[%s4687_s18 + $0x3f8] sm:$0xf0]  ;;  %v3322_v32 = vor.u32 %v3995_v20, %v3321_v18  ;;  %v3977_v8 = vld [vmem:[%s4687_s18 + $0x38c] sm:$0xf] }
  0xb9   : > { %1540 = vmatpush.bf16.msra.mxu3 %v2954_v46  ;;  %v3975_v46 = vld [vmem:[%s4687_s18 + $0x374] sm:$0xf0]  ;;  %v3114_v51 = vor.u32 %v3943_v41, %v3113_v40  ;;  %v3435_v36 = vld [vmem:[%s4687_s18 + $0x4f8] sm:$0xf0]  ;;  %v3921_v41 = vld [vmem:[%s4687_s18 + $0x1cc] sm:$0xf] }
  0xba   : > { %1502 = vmatpush.bf16.msra.mxu0 %v3190_v53  ;;  %v3242_v52 = vor.u32 %v3975_v46, %v3241_v44  ;;  %v3370_v53 = vor.u32 %v4007_v48, %v3369_v47  ;;  %v3035_v44 = vld [vmem:[%s4687_s18 + $0x1d8] sm:$0xf0]  ;;  %v3438_v46 = vor.u32 %v4021_v33, %v3435_v36  ;;  %v3985_v48 = vld [vmem:[%s4687_s18 + $0x3cc] sm:$0xf] }
  0xbb   : > { %1515 = vmatpush.bf16.msra.mxu1 %v3318_v57  ;;  %v2862_v57 = vor.u32 %v3877_v49, %v2859_v50  ;;  %v3163_v47 = vld [vmem:[%s4687_s18 + $0x2d8] sm:$0xf0]  ;;  %v4017_v50 = vld [vmem:[%s4687_s18 + $0x4cc] sm:$0xf] }
  0xbc   : > { %1528 = vmatpush.bf16.msra.mxu2 %v2810_v58  ;;  %v3971_v58 = vld [vmem:[%s4687_s18 + $0x354] sm:$0xf0]  ;;  %v3291_v49 = vld [vmem:[%s4687_s18 + $0x3d8] sm:$0xf0]  ;;  %v4001_v36 = vld [vmem:[%s4687_s18 + $0x44c] sm:$0xf] }
  0xbd   : > { %1541 = vmatpush.bf16.msra.mxu3 %v2938_v61  ;;  %1503 = vmatmul.bf16.vlgmr.msra.gmra.mxu0 %v4822_v42  ;;  %v3873_v61 = vld [vmem:[%s4687_s18 + $0x4c] sm:$0xf]  ;;  %v3131_v7 = vld [vmem:[%s4687_s18 + $0x298] sm:$0xf0] }
  0xbe   : > { %1547 = vmatpush.bf16.msrb.mxu0 %v3178_v62  ;;  %1516 = vmatmul.bf16.vlgmr.msra.gmra.mxu1 %v4863_v30  ;;  %v2843_v62 = vld [vmem:[%s4687_s18 + $0x58] sm:$0xf0] }
  0xbf   : > { %1560 = vmatpush.bf16.msrb.mxu1 %v3306_v63  ;;  %1529 = vmatmul.bf16.vlgmr.msra.gmra.mxu2 %v4815_v34  ;;  %v3098_v63 = vor.u32 %v3939_v55, %v3097_v54  ;;  %v2846_v5 = vor.u32 %v3873_v61, %v2843_v62  ;;  %v3294_v54 = vor.u32 %v3985_v48, %v3291_v49  ;;  %v3917_v55 = vld [vmem:[%s4687_s18 + $0x1ac] sm:$0xf]  ;;  %v3275_v61 = vld [vmem:[%s4687_s18 + $0x3b8] sm:$0xf0] }
  0xc0   : > { %1573 = vmatpush.bf16.msrb.mxu2 %v3434_v0  ;;  %1542 = vmatmul.bf16.vlgmr.msra.gmra.mxu3 %v4824_v43  ;;  %v3226_v0 = vor.u32 %v3971_v58, %v3225_v56  ;;  %v3019_v56 = vld [vmem:[%s4687_s18 + $0x1b8] sm:$0xf0]  ;;  %v4013_v62 = vld [vmem:[%s4687_s18 + $0x4ac] sm:$0xf] }
  0xc1   : > { %1586 = vmatpush.bf16.msrb.mxu3 %v2926_v4  ;;  %v3209_v4 = vld [vmem:[%s4687_s18 + $0x328] sm:$0xf]  ;;  %v3115_v18 = vld [vmem:[%s4687_s18 + $0x278] sm:$0xf0]  ;;  %v3965_v48 = vld [vmem:[%s4687_s18 + $0x32c] sm:$0xf] }
  0xc2   : > { %1548 = vmatpush.bf16.msrb.mxu0 %v3162_v10  ;;  %v2827_v10 = vld [vmem:[%s4687_s18 + $0x38] sm:$0xf0]  ;;  %v3210_v14 = vor.u32 %v3967_v6, %v3209_v4 }
  0xc3   : > { %1561 = vmatpush.bf16.msrb.mxu1 %v3290_v11  ;;  %v3082_v11 = vor.u32 %v3935_v3, %v3081_v2  ;;  %v2830_v19 = vor.u32 %v3869_v9, %v2827_v10  ;;  %v3278_v2 = vor.u32 %v3981_v60, %v3275_v61  ;;  %v3913_v3 = vld [vmem:[%s4687_s18 + $0x18c] sm:$0xf]  ;;  %v3003_v4 = vld [vmem:[%s4687_s18 + $0x198] sm:$0xf0] }
  0xc4   : > { %1574 = vmatpush.bf16.msrb.mxu2 %v3418_v12  ;;  %v3065_v12 = vld [vmem:[%s4687_s18 + $0x208] sm:$0xf]  ;;  %v3259_v9 = vld [vmem:[%s4687_s18 + $0x398] sm:$0xf0]  ;;  %v4009_v10 = vld [vmem:[%s4687_s18 + $0x48c] sm:$0xf] }
  0xc5   : > { %1587 = vmatpush.bf16.msrb.mxu3 %v2910_v16  ;;  %v3193_v16 = vld [vmem:[%s4687_s18 + $0x308] sm:$0xf]  ;;  %v3066_v26 = vor.u32 %v3931_v13, %v3065_v12  ;;  %v3262_v13 = vor.u32 %v3977_v8, %v3259_v9  ;;  %v3243_v20 = vld [vmem:[%s4687_s18 + $0x378] sm:$0xf0]  ;;  %v3961_v60 = vld [vmem:[%s4687_s18 + $0x30c] sm:$0xf] }
  0xc6   : > { %1549 = vmatpush.bf16.msrb.mxu0 %v3146_v22  ;;  %v2811_v22 = vld [vmem:[%s4687_s18 + $0x18] sm:$0xf0]  ;;  %v3194_v31 = vor.u32 %v3963_v17, %v3193_v16  ;;  %v3941_v16 = vld [vmem:[%s4687_s18 + $0x26c] sm:$0xf] }
  0xc7   : > { %1562 = vmatpush.bf16.msrb.mxu1 %v3274_v23  ;;  %v3925_v23 = vld [vmem:[%s4687_s18 + $0x1ec] sm:$0xf]  ;;  %v3227_v33 = vld [vmem:[%s4687_s18 + $0x358] sm:$0xf0] }
  0xc8   : > { %1575 = vmatpush.bf16.msrb.mxu2 %v3402_v24  ;;  %v3051_v24 = vld [vmem:[%s4687_s18 + $0x1f8] sm:$0xf0] }
  0xc9   : > { %1588 = vmatpush.bf16.msrb.mxu3 %v2894_v28  ;;  %v3989_v28 = vld [vmem:[%s4687_s18 + $0x3ec] sm:$0xf]  ;;  %v3211_v49 = vld [vmem:[%s4687_s18 + $0x338] sm:$0xf0] }
  0xca   : > { %1550 = vmatpush.bf16.msrb.mxu0 %v3130_v37  ;;  %v2814_v37 = vor.u32 %v3865_v21, %v2811_v22  ;;  %v3310_v40 = vor.u32 %v3989_v28, %v3307_v29  ;;  %v4005_v21 = vld [vmem:[%s4687_s18 + $0x46c] sm:$0xf]  ;;  %v3371_v22 = vld [vmem:[%s4687_s18 + $0x478] sm:$0xf0] }
  0xcb   : > { %1563 = vmatpush.bf16.msrb.mxu1 %v3258_v38  ;;  %v3054_v38 = vor.u32 %v3925_v23, %v3051_v24  ;;  %v3118_v24 = vor.u32 %v3941_v16, %v3115_v18  ;;  %v3937_v28 = vld [vmem:[%s4687_s18 + $0x24c] sm:$0xf]  ;;  %v3374_v29 = vor.u32 %v4005_v21, %v3371_v22  ;;  %v3195_v61 = vld [vmem:[%s4687_s18 + $0x318] sm:$0xf0] }
  0xcc   : > { %1576 = vmatpush.bf16.msrb.mxu2 %v3386_v39  ;;  %v3182_v39 = vor.u32 %v3957_v25, %v3179_v27  ;;  %v2971_v27 = vld [vmem:[%s4687_s18 + $0x158] sm:$0xf0] }
  0xcd   : > { %1589 = vmatpush.bf16.msrb.mxu3 %v2878_v45  ;;  %v3953_v45 = vld [vmem:[%s4687_s18 + $0x2cc] sm:$0xf] }
  0xce   : > { %1551 = vmatpush.bf16.msrb.mxu0 %v3114_v51  ;;  %v3419_v51 = vld [vmem:[%s4687_s18 + $0x4d8] sm:$0xf0] }
  0xcf   : > { %1564 = vmatpush.bf16.msrb.mxu1 %v3242_v52  ;;  %v3038_v52 = vor.u32 %v3921_v41, %v3035_v44  ;;  %v3422_v58 = vor.u32 %v4017_v50, %v3419_v51  ;;  %v3901_v41 = vld [vmem:[%s4687_s18 + $0x12c] sm:$0xf]  ;;  %v2955_v44 = vld [vmem:[%s4687_s18 + $0x138] sm:$0xf0] }
  0xd0   : > { %1577 = vmatpush.bf16.msrb.mxu2 %v3370_v53  ;;  %v3166_v53 = vor.u32 %v3953_v45, %v3163_v47  ;;  %v3933_v45 = vld [vmem:[%s4687_s18 + $0x22c] sm:$0xf]  ;;  %v3083_v47 = vld [vmem:[%s4687_s18 + $0x238] sm:$0xf0] }
  0xd1   : > { %1590 = vmatpush.bf16.msrb.mxu3 %v2862_v57  ;;  %v3949_v57 = vld [vmem:[%s4687_s18 + $0x2ac] sm:$0xf]  ;;  %v3339_v51 = vld [vmem:[%s4687_s18 + $0x438] sm:$0xf0] }
  0xd2   : > { %1552 = vmatpush.bf16.msrb.mxu0 %v3098_v63  ;;  %v3403_v63 = vld [vmem:[%s4687_s18 + $0x4b8] sm:$0xf0]  ;;  %v3997_v50 = vld [vmem:[%s4687_s18 + $0x42c] sm:$0xf] }
  0xd3   : > { %1565 = vmatpush.bf16.msrb.mxu1 %v3226_v0  ;;  %v3022_v0 = vor.u32 %v3917_v55, %v3019_v56  ;;  %v3406_v6 = vor.u32 %v4013_v62, %v3403_v63  ;;  %v3897_v55 = vld [vmem:[%s4687_s18 + $0x10c] sm:$0xf]  ;;  %v2939_v56 = vld [vmem:[%s4687_s18 + $0x118] sm:$0xf0] }
  0xd4   : > { %1578 = vmatpush.bf16.msrb.mxu2 %v3354_v1  ;;  %v3150_v1 = vor.u32 %v3949_v57, %v3147_v59  ;;  %v3929_v57 = vld [vmem:[%s4687_s18 + $0x20c] sm:$0xf]  ;;  %v3067_v59 = vld [vmem:[%s4687_s18 + $0x218] sm:$0xf0] }
  0xd5   : > { %1591 = vmatpush.bf16.msrb.mxu3 %v2846_v5  ;;  %v3945_v5 = vld [vmem:[%s4687_s18 + $0x28c] sm:$0xf]  ;;  %v3323_v63 = vld [vmem:[%s4687_s18 + $0x418] sm:$0xf0] }
  0xd6   : > { %1553 = vmatpush.bf16.msrb.mxu0 %v3082_v11  ;;  %v3006_v11 = vor.u32 %v3913_v3, %v3003_v4  ;;  %v3134_v12 = vor.u32 %v3945_v5, %v3131_v7  ;;  %v3993_v62 = vld [vmem:[%s4687_s18 + $0x40c] sm:$0xf] }
  0xd7   : > { %1566 = vmatpush.bf16.msrb.mxu1 %v3210_v14  ;;  %v3909_v14 = vld [vmem:[%s4687_s18 + $0x16c] sm:$0xf]  ;;  %v3326_v3 = vor.u32 %v3993_v62, %v3323_v63  ;;  %v408_v62 = vld [vmem:[#allocation2] sm:$0xff] }
  0xd8   : > { %1579 = vmatpush.bf16.msrb.mxu2 %v3338_v15  ;;  %v2987_v15 = vld [vmem:[%s4687_s18 + $0x178] sm:$0xf0] }
  0xd9   : > { %1592 = vmatpush.bf16.msrb.mxu3 %v2830_v19  ;;  %v3973_v19 = vld [vmem:[%s4687_s18 + $0x36c] sm:$0xf]  ;;  %v2990_v23 = vor.u32 %v3909_v14, %v2987_v15 }
  0xda   : > { %1554 = vmatpush.bf16.msrb.mxu0 %v3066_v26  ;;  %v3246_v25 = vor.u32 %v3973_v19, %v3243_v20  ;;  %v3905_v26 = vld [vmem:[%s4687_s18 + $0x14c] sm:$0xf] }
  0xdb   : > { %1567 = vmatpush.bf16.msrb.mxu1 %v3194_v31  ;;  %v3099_v31 = vld [vmem:[%s4687_s18 + $0x258] sm:$0xf0] }
  0xdc   : > { %1580 = vmatpush.bf16.msrb.mxu2 %v3322_v32  ;;  %v3969_v32 = vld [vmem:[%s4687_s18 + $0x34c] sm:$0xf] }
  0xdd   : > { %1593 = vmatpush.bf16.msrb.mxu3 %v2814_v37  ;;  %1555 = vmatmul.bf16.vlgmr.msrb.gmra.mxu0 %v4817_v35  ;;  %v3355_v37 = vld [vmem:[%s4687_s18 + $0x458] sm:$0xf0] }
  0xde   : > { %1599 = vmatpush.bf16.msra.mxu0 %v3054_v38  ;;  %1568 = vmatmul.bf16.vlgmr.msrb.gmra.mxu1 %v4822_v42  ;;  %v2974_v38 = vor.u32 %v3905_v26, %v2971_v27 }
  0xdf   : > { %1612 = vmatpush.bf16.msra.mxu1 %v3182_v39  ;;  %1581 = vmatmul.bf16.vlgmr.msrb.gmra.mxu2 %v4863_v30  ;;  %v3102_v39 = vor.u32 %v3937_v28, %v3099_v31 }
  0xe0   : > { %1625 = vmatpush.bf16.msra.mxu2 %v3310_v40  ;;  %1594 = vmatmul.bf16.vlgmr.msrb.gmra.mxu3 %v4815_v34  ;;  %v3387_v34 = vld [vmem:[%s4687_s18 + $0x498] sm:$0xf0]  ;;  %v3230_v40 = vor.u32 %v3969_v32, %v3227_v33 }
  0xe1   : > { %1638 = vmatpush.bf16.msra.mxu3 %v3438_v46  ;;  %v3390_v17 = vor.u32 %v4009_v10, %v3387_v34  ;;  %v3358_v46 = vor.u32 %v4001_v36, %v3355_v37 }
  0xe2   : > { %1600 = vmatpush.bf16.msra.mxu0 %v3038_v52  ;;  %v2958_v52 = vor.u32 %v3901_v41, %v2955_v44 }
  0xe3   : > { %1613 = vmatpush.bf16.msra.mxu1 %v3166_v53  ;;  %v3086_v53 = vor.u32 %v3933_v45, %v3083_v47 }
  0xe4   : > { %1626 = vmatpush.bf16.msra.mxu2 %v3294_v54  ;;  %v3214_v54 = vor.u32 %v3965_v48, %v3211_v49 }
  0xe5   : > { %1639 = vmatpush.bf16.msra.mxu3 %v3422_v58  ;;  %v3342_v58 = vor.u32 %v3997_v50, %v3339_v51 }
  0xe6   : > { %1601 = vmatpush.bf16.msra.mxu0 %v3022_v0  ;;  %v2942_v0 = vor.u32 %v3897_v55, %v2939_v56 }
  0xe7   : > { %1614 = vmatpush.bf16.msra.mxu1 %v3150_v1  ;;  %v3070_v1 = vor.u32 %v3929_v57, %v3067_v59 }
  0xe8   : > { %1627 = vmatpush.bf16.msra.mxu2 %v3278_v2  ;;  %v3198_v2 = vor.u32 %v3961_v60, %v3195_v61 }
  0xe9   : > { %1640 = vmatpush.bf16.msra.mxu3 %v3406_v6 }
  0xea   : > { %1602 = vmatpush.bf16.msra.mxu0 %v3006_v11 }
  0xeb   : > { %1615 = vmatpush.bf16.msra.mxu1 %v3134_v12 }
  0xec   : > { %1628 = vmatpush.bf16.msra.mxu2 %v3262_v13 }
  0xed   : > { %1641 = vmatpush.bf16.msra.mxu3 %v3390_v17 }
  0xee   : > { %1603 = vmatpush.bf16.msra.mxu0 %v2990_v23 }
  0xef   : > { %1616 = vmatpush.bf16.msra.mxu1 %v3118_v24 }
  0xf0   : > { %1629 = vmatpush.bf16.msra.mxu2 %v3246_v25 }
  0xf1   : > { %1642 = vmatpush.bf16.msra.mxu3 %v3374_v29 }
  0xf2   : > { %1604 = vmatpush.bf16.msra.mxu0 %v2974_v38 }
  0xf3   : > { %1617 = vmatpush.bf16.msra.mxu1 %v3102_v39 }
  0xf4   : > { %1630 = vmatpush.bf16.msra.mxu2 %v3230_v40 }
  0xf5   : > { %1643 = vmatpush.bf16.msra.mxu3 %v3358_v46 }
  0xf6   : > { %1605 = vmatpush.bf16.msra.mxu0 %v2958_v52 }
  0xf7   : > { %1618 = vmatpush.bf16.msra.mxu1 %v3086_v53 }
  0xf8   : > { %1631 = vmatpush.bf16.msra.mxu2 %v3214_v54 }
  0xf9   : > { %1644 = vmatpush.bf16.msra.mxu3 %v3342_v58 }
  0xfa   : > { %1606 = vmatpush.bf16.msra.mxu0 %v2942_v0 }
  0xfb   : > { %1619 = vmatpush.bf16.msra.mxu1 %v3070_v1 }
  0xfc   : > { %1632 = vmatpush.bf16.msra.mxu2 %v3198_v2 }
  0xfd   : > { %1645 = vmatpush.bf16.msra.mxu3 %v3326_v3  ;;  %1607 = vmatmul.bf16.vlgmr.msra.gmra.mxu0 %v4824_v43 }
  0xfe   : > { %1620 = vmatmul.bf16.vlgmr.msra.gmra.mxu1 %v4817_v35 }
  0xff   : > { %1633 = vmatmul.bf16.vlgmr.msra.gmra.mxu2 %v4822_v42 }
 0x100   : > { %1646 = vmatmul.bf16.vlgmr.msra.gmra.mxu3 %v4863_v30 }
 0x106   : > { %v1400_v4 = vpop.f32.mrf.mxu0 }
 0x109   : > { %v1413_v5 = vpop.f32.mrf.mxu1 }
 0x10a   : > { %v1414_v6 = vadd.f32 %v1413_v5, %v1400_v4 }
 0x10d   : > { %v1426_v7 = vpop.f32.mrf.mxu2 }
 0x10e   : > { %v1427_v8 = vadd.f32 %v1426_v7, %v1414_v6  ;;  %v1439_v9 = vpop.f32.mrf.mxu3  ;;  %v1402_v10 = vpop.f32.mrf.mxu0 }
 0x110   : > { %v1440_v34 = vadd.f32 %v1439_v9, %v1427_v8 }
 0x111   : > { %v1415_v11 = vpop.f32.mrf.mxu1 }
 0x115   : > { %v1428_v12 = vpop.f32.mrf.mxu2 }
 0x116   : > { %v1441_v13 = vpop.f32.mrf.mxu3 }
 0x11a   : > { %v1452_v14 = vpop.f32.mrf.mxu0 }
 0x11b   : > { %v1453_v15 = vadd.f32 %v1452_v14, %v1440_v34  ;;  %v1465_v43 = vpop.f32.mrf.mxu1 }
 0x122   : > { %v1478_v16 = vpop.f32.mrf.mxu2  ;;  %v1454_v17 = vpop.f32.mrf.mxu0 }
 0x123   : > { %v1491_v35 = vpop.f32.mrf.mxu3  ;;  %v1479_v42 = vadd.f32 %v1478_v16, %v1465_v43  ;;  %v1467_v18 = vpop.f32.mrf.mxu1 }
 0x125   : > { %v1492_v30 = vadd.f32 %v1491_v35, %v1479_v42 }
 0x12a   : > { %v1480_v19 = vpop.f32.mrf.mxu2 }
 0x12b   : > { %v1493_v20 = vpop.f32.mrf.mxu3 }
 0x13a   : > { %v1504_v21 = vpop.f32.mrf.mxu0 }
 0x13b   : > { %v1505_v22 = vadd.f32 %v1504_v21, %v1492_v30  ;;  %v1517_v23 = vpop.f32.mrf.mxu1 }
 0x13d   : > { %v1518_v24 = vadd.f32 %v1517_v23, %v1505_v22 }
 0x13f   : > { %v1655_v25 = vrot.slane %v1518_v24, 6 }
 0x141   : > { %v1659_v26 = vsel %vm1658_vm0, %v1453_v15, %v1655_v25 }
 0x142   : > { %v1530_v27 = vpop.f32.mrf.mxu2  ;;  %v1506_v28 = vpop.f32.mrf.mxu0 }
 0x143   : > { %v1543_v29 = vpop.f32.mrf.mxu3  ;;  %v1519_v31 = vpop.f32.mrf.mxu1 }
 0x144   : > { %v1544_v46 = vadd.f32 %v1543_v29, %v1530_v27 }
 0x14a   : > { %v1532_v32 = vpop.f32.mrf.mxu2 }
 0x14b   : > { %v1545_v33 = vpop.f32.mrf.mxu3 }
 0x15a   : > { %v1556_v36 = vpop.f32.mrf.mxu0 }
 0x15b   : > { %v1569_v37 = vpop.f32.mrf.mxu1  ;;  %v1557_v47 = vadd.f32 %v1556_v36, %v1544_v46 }
 0x15d   : > { %v1570_v51 = vadd.f32 %v1569_v37, %v1557_v47 }
 0x162   : > { %v1582_v38 = vpop.f32.mrf.mxu2  ;;  %v1558_v40 = vpop.f32.mrf.mxu0 }
 0x163   : > { %v1595_v39 = vpop.f32.mrf.mxu3  ;;  %v1571_v41 = vpop.f32.mrf.mxu1  ;;  %v1583_v54 = vadd.f32 %v1582_v38, %v1570_v51 }
 0x165   : > { %v1656_v60 = vrot.slane %v1583_v54, 4 }
 0x16a   : > { %v1584_v44 = vpop.f32.mrf.mxu2 }
 0x16b   : > { %v1597_v45 = vpop.f32.mrf.mxu3 }
 0x17a   : > { %v1608_v48 = vpop.f32.mrf.mxu0 }
 0x17b   : > { %v1621_v49 = vpop.f32.mrf.mxu1  ;;  %v1609_v50 = vadd.f32 %v1608_v48, %v1595_v39 }
 0x17d   : > { %v1622_v52 = vadd.f32 %v1621_v49, %v1609_v50 }
 0x182   : > { %v1634_v53 = vpop.f32.mrf.mxu2  ;;  %v1610_v57 = vpop.f32.mrf.mxu0 }
 0x183   : > { %v1635_v55 = vadd.f32 %v1634_v53, %v1622_v52  ;;  %v1647_v56 = vpop.f32.mrf.mxu3  ;;  %v1623_v58 = vpop.f32.mrf.mxu1 }
 0x185   : > { %v1648_v59 = vadd.f32 %v1647_v56, %v1635_v55 }
 0x187   : > { %v1657_v61 = vrot.slane %v1648_v59, 2 }
 0x189   : > { %v1661_v63 = vsel %vm1660_vm1, %v1656_v60, %v1657_v61  ;;  %1670 = sbr.rel (%p3439_p1) target bundleno = 1019 (0x3fb), region = 84 }
 0x18a   : > { %v1663_v0 = vsel %vm1662_vm2, %v1659_v26, %v1661_v63  ;;  %v1636_v1 = vpop.f32.mrf.mxu2 }
 0x18b   : > { %v1665_v2 = vadd.f32 %v1663_v0, %v408_v62  ;;  %v1649_v3 = vpop.f32.mrf.mxu3 }
 0x18d   : > { %1666 = vst [vmem:[#allocation2] sm:$0xff] %v1665_v2 }
 0x18e   : > { %v1672_v4 = vld [vmem:[#allocation7] sm:$0xf]  ;;  %v4510_v15 = vmov 1934713408   ;;  %vm1695_vm3 = vcmask 1047556   ;;  %v4511_v32 = vmov 128.0   ;;  %v1748_v44 = vlaneseq }
 0x18f   : > { %v1674_v5 = vperm.slane %v1672_v4, 0  ;;  %v1675_v6 = vperm.slane %v1672_v4, 1  ;;  %v1676_v7 = vperm.slane %v1672_v4, 2  ;;  %v1677_v8 = vperm.slane %v1672_v4, 3  ;;  %v1741_v33 = vld [vmem:[#allocation8] sm:$0xf]  ;;  %vm5106_vm11 = vmneg %vm1695_vm3 }
 0x190   : > { %v1698_v43 = vunpack.c.l.s4 %v4510_v15  ;;  %4232 = vrcp.f32 %v4511_v32  ;;  %3442 = vmatpush.msk.msra.mxu0 %vm1662_vm2, %v1741_v33  ;;  %v1749_v46 = vand.u32 127, %v1748_v44  ;;  %vm1752_vm5 = vcmask 1041409   ;;  %v4231_v54 = vld [vmem:[#allocation10] ss:$0 sm:$0xff]  ;;  %v3531_v58 = vld [vmem:[#allocation11 + $0xa8] sm:$0xf]  ;;  %vm5119_vm12 = vmpackc.low %vm5106_vm11, %vm5106_vm11 }
 0x191   : > { %v1678_v9 = vrot.slane %v1675_v6, 6  ;;  %v1679_v10 = vrot.slane %v1676_v7, 4  ;;  %v1680_v34 = vrot.slane %v1677_v8, 2  ;;  %vm1754_vm6 = vcmask 31744   ;;  %v4046_v59 = vld [vmem:[#allocation11 + $0xb0] sm:$0xf0] }
 0x192   : > { %v5066_v17 = vunpack.c.0.s8 %v1698_v43  ;;  %v1801_v53 = vshrl.u32 %v1748_v44, 7  ;;  %v3723_v60 = vld [vmem:[#allocation11 + $0x228] sm:$0xf]  ;;  %v3532_v61 = vor.u32 %v4046_v59, %v3531_v58  ;;  %v4094_v62 = vld [vmem:[#allocation11 + $0x230] sm:$0xf0] }
 0x193   : > { %v1681_v12 = vsel %vm1658_vm0, %v1674_v5, %v1678_v9  ;;  %v1682_v13 = vsel %vm1660_vm1, %v1679_v10, %v1680_v34  ;;  %v3627_v63 = vld [vmem:[#allocation11 + $0x168] sm:$0xf]  ;;  %v4070_v0 = vld [vmem:[#allocation11 + $0x170] sm:$0xf0]  ;;  %v3724_v2 = vor.u32 %v4094_v62, %v3723_v60  ;;  %v3519_v6 = vld [vmem:[#allocation11 + $0x90] sm:$0xf] }
 0x194   : > { %v1671_v11 = vld [vmem:[#allocation2] sm:$0xff]  ;;  %v1683_v14 = vsel %vm1662_vm2, %v1681_v12, %v1682_v13  ;;  %4229 = vset.pattern.permute.xlu1 %v1801_v53  ;;  %4230 = vset.pattern.permute.xlu0 %v1801_v53  ;;  %v3628_v3 = vor.u32 %v4070_v0, %v3627_v63  ;;  %v3819_v4 = vld [vmem:[#allocation11 + $0x2e8] sm:$0xf]  ;;  %v4118_v5 = vld [vmem:[#allocation11 + $0x2f0] sm:$0xf0] }
 0x195   : > { %v1685_v16 = vadd.f32 %v1683_v14, %v1671_v11  ;;  %2507 = vmatpush.bf16.msra.mxu1 %v3532_v61  ;;  %v3820_v8 = vor.u32 %v4118_v5, %v3819_v4  ;;  %v4043_v9 = vld [vmem:[#allocation11 + $0x98] sm:$0xf0]  ;;  %v3711_v10 = vld [vmem:[#allocation11 + $0x210] sm:$0xf]  ;;  %2533 = vmatpush.bf16.msra.mxu3 %v3724_v2  ;;  %v3495_v32 = vld [vmem:[#allocation11 + $0x60] sm:$0xf] }
 0x196   : > { %v4233_v36 = vpop.eup %4232  ;;  %2520 = vmatpush.bf16.msra.mxu2 %v3628_v3  ;;  %v3520_v34 = vor.u32 %v4043_v9, %v3519_v6  ;;  %v4091_v11 = vld [vmem:[#allocation11 + $0x218] sm:$0xf0]  ;;  %v3615_v12 = vld [vmem:[#allocation11 + $0x150] sm:$0xf]  ;;  %v4037_v33 = vld [vmem:[#allocation11 + $0x68] sm:$0xf0] }
 0x197   : > { %v1686_v35 = vmax.f32 %v1685_v16, 0.0  ;;  %v1733_v37 = vmul.f32 128.0, %v4233_v36  ;;  %vm1737_vm4 = vweird.f32 %v4233_v36  ;;  %v4067_v13 = vld [vmem:[#allocation11 + $0x158] sm:$0xf0]  ;;  %2546 = vmatpush.bf16.msrb.mxu0 %v3820_v8  ;;  %v3807_v14 = vld [vmem:[#allocation11 + $0x2d0] sm:$0xf]  ;;  %v3712_v15 = vor.u32 %v4091_v11, %v3711_v10 }
 0x198   : > { %v3616_v43 = vor.u32 %v4067_v13, %v3615_v12  ;;  %v4115_v16 = vld [vmem:[#allocation11 + $0x2d8] sm:$0xf0]  ;;  %v4061_v44 = vld [vmem:[#allocation11 + $0x128] sm:$0xf0]  ;;  %v3675_v53 = vld [vmem:[#allocation11 + $0x1c8] sm:$0xf] }
 0x199   : > { %v1690_v42 = vrot.slane %v1686_v35, 4  ;;  %v3440_v18 = vrot.slane %v1686_v35, 6  ;;  %v3441_v30 = vrot.slane %v1686_v35, 10  ;;  %v1734_v38 = vsub.f32 1.0, %v1733_v37  ;;  %2508 = vmatpush.bf16.msra.mxu1 %v3520_v34  ;;  %2534 = vmatpush.bf16.msra.mxu3 %v3712_v15  ;;  %v3687_v37 = vld [vmem:[#allocation11 + $0x1e0] sm:$0xf] }
 0x19a   : > { %2521 = vmatpush.bf16.msra.mxu2 %v3616_v43  ;;  %v3771_v58 = vld [vmem:[#allocation11 + $0x288] sm:$0xf]  ;;  %v4106_v62 = vld [vmem:[#allocation11 + $0x290] sm:$0xf0]  ;;  %v3471_v2 = vld [vmem:[#allocation11 + $0x30] sm:$0xf] }
 0x19b   : > { %v1696_v19 = vsel %vm1695_vm3, %v3440_v18, %v1686_v35  ;;  %v1704_v20 = vsel %vm1695_vm3, %v3441_v30, %v1690_v42  ;;  %v1735_v39 = vmul.f32 %v4233_v36, %v1734_v38  ;;  %v3507_v35 = vld [vmem:[#allocation11 + $0x78] sm:$0xf]  ;;  %v4040_v42 = vld [vmem:[#allocation11 + $0x80] sm:$0xf0]  ;;  %v3808_v18 = vor.u32 %v4115_v16, %v3807_v14  ;;  %v4085_v38 = vld [vmem:[#allocation11 + $0x1e8] sm:$0xf0] }
 0x19c   : > { %v5071_v21 = vperm.slane %v1696_v19, %v5066_v17  ;;  %v5074_v22 = vperm.slane %v1704_v20, %v5066_v17  ;;  %v3508_v30 = vor.u32 %v4040_v42, %v3507_v35  ;;  %v3699_v19 = vld [vmem:[#allocation11 + $0x1f8] sm:$0xf]  ;;  %v4088_v20 = vld [vmem:[#allocation11 + $0x200] sm:$0xf0]  ;;  %v4031_v3 = vld [vmem:[#allocation11 + $0x38] sm:$0xf0]  ;;  %v3772_v4 = vor.u32 %v4106_v62, %v3771_v58 }
 0x19d   : > { %v1736_v40 = vadd.f32 %v4233_v36, %v1735_v39  ;;  %2547 = vmatpush.bf16.msrb.mxu0 %v3808_v18  ;;  %v3591_v39 = vld [vmem:[#allocation11 + $0x120] sm:$0xf]  ;;  %v3663_v5 = vld [vmem:[#allocation11 + $0x1b0] sm:$0xf]  ;;  %v4079_v6 = vld [vmem:[#allocation11 + $0x1b8] sm:$0xf0]  ;;  %v3472_v13 = vor.u32 %v4031_v3, %v3471_v2 }
 0x19e   : > { %1715 = vst [vmem:[#allocation1] ss:$4 sm:$0xff] %v5071_v21  ;;  %v1701_v23 = vrot.slane %v5071_v21, 4  ;;  %v1709_v24 = vrot.slane %v5074_v22, 4  ;;  %2509 = vmatpush.bf16.msra.mxu1 %v3508_v30  ;;  %v3567_v8 = vld [vmem:[#allocation11 + $0xf0] sm:$0xf]  ;;  %v3664_v15 = vor.u32 %v4079_v6, %v3663_v5 }
 0x19f   : > { %1717 = vst [vmem:[#allocation1 + $0x1] ss:$4 sm:$0xff] %v5074_v22  ;;  %v1738_v45 = vsel %vm1737_vm4, %v4233_v36, %v1736_v40  ;;  %v4055_v10 = vld [vmem:[#allocation11 + $0xf8] sm:$0xf0]  ;;  %v3759_v34 = vld [vmem:[#allocation11 + $0x270] sm:$0xf] }
 0x1a0   : > { %v5081_v25 = vsel %vm1695_vm3, 0.0, %v1701_v23  ;;  %v5084_v26 = vsel %vm1695_vm3, 0.0, %v1709_v24  ;;  %v3700_v23 = vor.u32 %v4088_v20, %v3699_v19  ;;  %v3603_v24 = vld [vmem:[#allocation11 + $0x138] sm:$0xf]  ;;  %v4103_v11 = vld [vmem:[#allocation11 + $0x278] sm:$0xf0]  ;;  %v3568_v18 = vor.u32 %v4055_v10, %v3567_v8 }
 0x1a1   : > { %1720 = vst [vmem:[#allocation1 + $0x20] ss:$4 sm:$0xff] %v5081_v25  ;;  %v3459_v43 = vld [vmem:[#allocation11 + $0x18] sm:$0xf]  ;;  %v4028_v16 = vld [vmem:[#allocation11 + $0x20] sm:$0xf0] }
 0x1a2   : > { %1722 = vst [vmem:[#allocation1 + $0x21] ss:$4 sm:$0xff] %v5084_v26  ;;  %2535 = vmatpush.bf16.msra.mxu3 %v3700_v23  ;;  %v3651_v35 = vld [vmem:[#allocation11 + $0x198] sm:$0xf]  ;;  %v4076_v30 = vld [vmem:[#allocation11 + $0x1a0] sm:$0xf0] }
 0x1a3   : > { %v3555_v19 = vld [vmem:[#allocation11 + $0xd8] sm:$0xf]  ;;  %v4052_v20 = vld [vmem:[#allocation11 + $0xe0] sm:$0xf0]  ;;  %v4042_v58 = vld [vmem:[#allocation11 + $0x94] sm:$0xf] }
 0x1a4   : > { %v4090_v62 = vld [vmem:[#allocation11 + $0x214] sm:$0xf]  ;;  %v3617_v3 = vld [vmem:[#allocation11 + $0x15c] sm:$0xf0]  ;;  %v3509_v10 = vld [vmem:[#allocation11 + $0x84] sm:$0xf0] }
 0x1a5   : > { %v4066_v2 = vld [vmem:[#allocation11 + $0x154] sm:$0xf]  ;;  %v3809_v5 = vld [vmem:[#allocation11 + $0x2dc] sm:$0xf0] }
 0x1a6   : > { %v1718_v27 = vld.sshfl [vmem:[#allocation1] sm:$0xff pattern:$0x73625140] }
 0x1a7   : > { %v1726_v28 = vsel %vm1662_vm2, %v1718_v27, 0.0  ;;  %v4064_v27 = vld [vmem:[#allocation11 + $0x140] sm:$0xf0] }
 0x1a8   : > { %1727 = vadd.xlane.f32.xlu0 %v1726_v28  ;;  %v3795_v28 = vld [vmem:[#allocation11 + $0x2b8] sm:$0xf] }
 0x1a9   : > { %v1723_v29 = vld.sshfl [vmem:[#allocation1 + $0x20] sm:$0xff pattern:$0x73625140] }
 0x1aa   : > { %v1729_v31 = vsel %vm1662_vm2, %v1723_v29, 0.0  ;;  %v3604_v29 = vor.u32 %v4064_v27, %v3603_v24  ;;  %v3747_v24 = vld [vmem:[#allocation11 + $0x258] sm:$0xf]  ;;  %v4100_v27 = vld [vmem:[#allocation11 + $0x260] sm:$0xf0] }
 0x1ac   : > { %2522 = vmatpush.bf16.msra.mxu2 %v3604_v29  ;;  %v3447_v29 = vld [vmem:[#allocation11] sm:$0xf] }
 0x1b0   : > { %1730 = vadd.xlane.f32.xlu0 %v1729_v31  ;;  %v4112_v31 = vld [vmem:[#allocation11 + $0x2c0] sm:$0xf0] }
 0x1b1   : > { %v3796_v36 = vor.u32 %v4112_v31, %v3795_v28  ;;  %v3460_v28 = vor.u32 %v4028_v16, %v3459_v43  ;;  %v3652_v31 = vor.u32 %v4076_v30, %v3651_v35  ;;  %v4111_v43 = vld [vmem:[#allocation11 + $0x2bc] sm:$0xf]  ;;  %v3797_v16 = vld [vmem:[#allocation11 + $0x2c4] sm:$0xf0]  ;;  %v4036_v30 = vld [vmem:[#allocation11 + $0x64] sm:$0xf] }
 0x1b3   : > { %2548 = vmatpush.bf16.msrb.mxu0 %v3796_v36  ;;  %v4073_v36 = vld [vmem:[#allocation11 + $0x188] sm:$0xf0] }
 0x21b   : > { %v1728_v41 = vpop.xlane.xlu0 %1727 }
 0x21c   : > { %v1739_v47 = vmul.f32 %v1738_v45, %v1728_v41  ;;  %v3496_v41 = vor.u32 %v4037_v33, %v3495_v32  ;;  %v4025_v32 = vld [vmem:[#allocation11 + $0x8] sm:$0xf0]  ;;  %v3639_v33 = vld [vmem:[#allocation11 + $0x180] sm:$0xf] }
 0x21e   : > { %v1750_v50 = vperm.slane %v1739_v47, %v1749_v46  ;;  %2510 = vmatpush.bf16.msra.mxu1 %v3496_v41  ;;  %v4093_v41 = vld [vmem:[#allocation11 + $0x22c] sm:$0xf] }
 0x223   : > { %v1731_v48 = vpop.xlane.xlu0 %1730 }
 0x224   : > { %v1740_v49 = vmul.f32 %v1738_v45, %v1731_v48  ;;  %v3783_v45 = vld [vmem:[#allocation11 + $0x2a0] sm:$0xf]  ;;  %v3688_v48 = vor.u32 %v4085_v38, %v3687_v37  ;;  %v3556_v37 = vor.u32 %v4052_v20, %v3555_v19  ;;  %v3748_v38 = vor.u32 %v4100_v27, %v3747_v24  ;;  %v3497_v19 = vld [vmem:[#allocation11 + $0x6c] sm:$0xf0]  ;;  %v4084_v20 = vld [vmem:[#allocation11 + $0x1e4] sm:$0xf] }
 0x225   : > { %v3689_v24 = vld [vmem:[#allocation11 + $0x1ec] sm:$0xf0] }
 0x226   : > { %v1751_v51 = vperm.slane %v1740_v49, %v1749_v46  ;;  %v4109_v46 = vld [vmem:[#allocation11 + $0x2a8] sm:$0xf0]  ;;  %v3592_v49 = vor.u32 %v4061_v44, %v3591_v39  ;;  %2536 = vmatpush.bf16.msra.mxu3 %v3688_v48  ;;  %v3725_v44 = vld [vmem:[#allocation11 + $0x234] sm:$0xf0]  ;;  %v3735_v48 = vld [vmem:[#allocation11 + $0x240] sm:$0xf]  ;;  %v3692_v27 = vor.u32 %v4084_v20, %v3689_v24 }
 0x227   : > { %v4045_v39 = vld [vmem:[#allocation11 + $0xac] sm:$0xf] }
 0x228   : > { %v1753_v52 = vsel %vm1752_vm5, %v1751_v51, %v1750_v50  ;;  %v3483_v50 = vld [vmem:[#allocation11 + $0x48] sm:$0xf]  ;;  %v4034_v51 = vld [vmem:[#allocation11 + $0x50] sm:$0xf0]  ;;  %2523 = vmatpush.bf16.msra.mxu2 %v3592_v49  ;;  %v4097_v49 = vld [vmem:[#allocation11 + $0x248] sm:$0xf0] }
 0x229   : > { %3443 = vmatmul.msk.f32.vlgmr.msra.gmra.mxu0 %vm1754_vm6, %v1753_v52  ;;  %v3784_v52 = vor.u32 %v4109_v46, %v3783_v45  ;;  %v3484_v61 = vor.u32 %v4034_v51, %v3483_v50  ;;  %v3543_v45 = vld [vmem:[#allocation11 + $0xc0] sm:$0xf]  ;;  %v4049_v46 = vld [vmem:[#allocation11 + $0xc8] sm:$0xf0]  ;;  %v3640_v51 = vor.u32 %v4073_v36, %v3639_v33  ;;  %v3785_v33 = vld [vmem:[#allocation11 + $0x2ac] sm:$0xf0] }
 0x22a   : > { %v4069_v50 = vld [vmem:[#allocation11 + $0x16c] sm:$0xf] }
 0x22b   : > { %2549 = vmatpush.bf16.msrb.mxu0 %v3784_v52  ;;  %2511 = vmatpush.bf16.msra.mxu1 %v3484_v61  ;;  %v3629_v52 = vld [vmem:[#allocation11 + $0x174] sm:$0xf0]  ;;  %v3521_v61 = vld [vmem:[#allocation11 + $0x9c] sm:$0xf0] }
 0x22c   : > { %v3524_v6 = vor.u32 %v4042_v58, %v3521_v61  ;;  %v3569_v58 = vld [vmem:[#allocation11 + $0xfc] sm:$0xf0] }
 0x22d   : > { %v3761_v61 = vld [vmem:[#allocation11 + $0x27c] sm:$0xf0] }
 0x22f   : > { %2550 = vmatpush.bf16.msrb.mxu0 %v3772_v4  ;;  %2512 = vmatpush.bf16.msra.mxu1 %v3472_v13  ;;  %v4114_v4 = vld [vmem:[#allocation11 + $0x2d4] sm:$0xf] }
 0x230   : > { %v3812_v13 = vor.u32 %v4114_v4, %v3809_v5  ;;  %v4051_v4 = vld [vmem:[#allocation11 + $0xdc] sm:$0xf]  ;;  %v3557_v5 = vld [vmem:[#allocation11 + $0xe4] sm:$0xf0] }
 0x233   : > { %2513 = vmatpush.bf16.msra.mxu1 %v3460_v28  ;;  %v4060_v28 = vld [vmem:[#allocation11 + $0x124] sm:$0xf] }
 0x2a6   : > { %v1777_v55 = vpop.f32.mrf.mxu0 }
 0x2a7   : > { %v1778_v56 = vadd.f32 %v4231_v54, %v1777_v55  ;;  %v4082_v54 = vld [vmem:[#allocation11 + $0x1d0] sm:$0xf0]  ;;  %v3579_v55 = vld [vmem:[#allocation11 + $0x108] sm:$0xf] }
 0x2a8   : > { %v3676_v0 = vor.u32 %v4082_v54, %v3675_v53  ;;  %v4117_v53 = vld [vmem:[#allocation11 + $0x2ec] sm:$0xf]  ;;  %v3821_v54 = vld [vmem:[#allocation11 + $0x2f4] sm:$0xf0] }
 0x2a9   : > { %v3444_v57 = vmul.f32 -1.442695, %v1778_v56 }
 0x2aa   : > { %2537 = vmatpush.bf16.msra.mxu3 %v3676_v0  ;;  %v3632_v0 = vor.u32 %v4069_v50, %v3629_v52  ;;  %v3473_v52 = vld [vmem:[#allocation11 + $0x3c] sm:$0xf0] }
 0x2ab   : > { %4234 = vpow2.f32 %v3444_v57  ;;  %v4058_v57 = vld [vmem:[#allocation11 + $0x110] sm:$0xf0] }
 0x2ae   : > { %2538 = vmatpush.bf16.msra.mxu3 %v3664_v15  ;;  %v3605_v15 = vld [vmem:[#allocation11 + $0x144] sm:$0xf0] }
 0x2b1   : > { %v4235_v1 = vpop.eup %4234 }
 0x2b2   : > { %v5091_v7 = vadd.f32 1.0, %v4235_v1  ;;  %v3580_v1 = vor.u32 %v4058_v57, %v3579_v55  ;;  %2539 = vmatpush.bf16.msra.mxu3 %v3652_v31  ;;  %v3728_v57 = vor.u32 %v4093_v41, %v3725_v44  ;;  %v4108_v31 = vld [vmem:[#allocation11 + $0x2a4] sm:$0xf]  ;;  %v3677_v41 = vld [vmem:[#allocation11 + $0x1d4] sm:$0xf0] }
 0x2b3   : > { %v3788_v36 = vor.u32 %v4108_v31, %v3785_v33 }
 0x2b4   : > { %4236 = vrcp.f32 %v5091_v7  ;;  %v1793_v59 = vand.u32 2147483647, %v5091_v7  ;;  %v1795_v60 = vand.u32 2147483648, %v5091_v7  ;;  %vm1789_vm8 = vweird.f32 %v5091_v7  ;;  %2524 = vmatpush.bf16.msra.mxu2 %v3580_v1 }
 0x2b5   : > { %v3824_v1 = vor.u32 %v4117_v53, %v3821_v54  ;;  %v4078_v53 = vld [vmem:[#allocation11 + $0x1b4] sm:$0xf] }
 0x2b6   : > { %vm1794_vm10 = vcmp.eq.f32.partialorder %v1793_v59, 8.507059e+37  ;;  %v1796_v12 = vor.u32 1.1754944e-38, %v1795_v60  ;;  %v3544_v59 = vor.u32 %v4049_v46, %v3543_v45  ;;  %v3736_v60 = vor.u32 %v4097_v49, %v3735_v48  ;;  %2540 = vmatpush.bf16.msra.mxu3 %v3640_v51  ;;  %v4057_v45 = vld [vmem:[#allocation11 + $0x10c] sm:$0xf]  ;;  %v3581_v46 = vld [vmem:[#allocation11 + $0x114] sm:$0xf0] }
 0x2b7   : > { %v3584_v48 = vor.u32 %v4057_v45, %v3581_v46  ;;  %v3773_v49 = vld [vmem:[#allocation11 + $0x294] sm:$0xf0]  ;;  %v4030_v51 = vld [vmem:[#allocation11 + $0x34] sm:$0xf]  ;;  %v3539_v46 = vld [vmem:[#allocation11 + $0xb0] sm:$0xf] }
 0x2b8   : > { %2525 = vmatpush.bf16.msra.mxu2 %v3568_v18  ;;  %v3476_v54 = vor.u32 %v4030_v51, %v3473_v52 }
 0x2ba   : > { %v4237_v40 = vpop.eup %4236  ;;  %2585 = vmatpush.bf16.msrb.mxu3 %v3728_v57  ;;  %v4054_v57 = vld [vmem:[#allocation11 + $0xf4] sm:$0xf] }
 0x2bb   : > { %v1785_v47 = vmul.f32 %v4237_v40, %v5091_v7  ;;  %vm1790_vm7 = vweird.f32 %v4237_v40  ;;  %v3760_v7 = vor.u32 %v4103_v11, %v3759_v34  ;;  %v4087_v34 = vld [vmem:[#allocation11 + $0x1fc] sm:$0xf]  ;;  %v3701_v11 = vld [vmem:[#allocation11 + $0x204] sm:$0xf0] }
 0x2bc   : > { %vm1791_vm9 = vmor %vm1789_vm8, %vm1790_vm7  ;;  %2526 = vmatpush.bf16.msra.mxu2 %v3556_v37  ;;  %v4033_v37 = vld [vmem:[#allocation11 + $0x4c] sm:$0xf] }
 0x2bd   : > { %v1786_v56 = vsub.f32 1.0, %v1785_v47  ;;  %2551 = vmatpush.bf16.msrb.mxu0 %v3760_v7  ;;  %v3448_v47 = vor.u32 %v4025_v32, %v3447_v29  ;;  %v3800_v7 = vor.u32 %v4111_v43, %v3797_v16  ;;  %v3593_v29 = vld [vmem:[#allocation11 + $0x12c] sm:$0xf0]  ;;  %v4048_v16 = vld [vmem:[#allocation11 + $0xc4] sm:$0xf] }
 0x2be   : > { %v3596_v32 = vor.u32 %v4060_v28, %v3593_v29 }
 0x2bf   : > { %v1787_v63 = vmul.f32 %v4237_v40, %v1786_v56  ;;  %2514 = vmatpush.bf16.msra.mxu1 %v3448_v47  ;;  %v4105_v47 = vld [vmem:[#allocation11 + $0x28c] sm:$0xf] }
 0x2c0   : > { %2527 = vmatpush.bf16.msra.mxu2 %v3544_v59  ;;  %v3776_v50 = vor.u32 %v4105_v47, %v3773_v49  ;;  %v4102_v59 = vld [vmem:[#allocation11 + $0x274] sm:$0xf]  ;;  %v4047_v47 = vld [vmem:[#allocation11 + $0xb8] sm:$0xf0] }
 0x2c1   : > { %v1788_v9 = vadd.f32 %v4237_v40, %v1787_v63  ;;  %2552 = vmatpush.bf16.msrb.mxu0 %v3748_v38  ;;  %v3713_v63 = vld [vmem:[#allocation11 + $0x21c] sm:$0xf0]  ;;  %v3485_v38 = vld [vmem:[#allocation11 + $0x54] sm:$0xf0]  ;;  %v4095_v49 = vld [vmem:[#allocation11 + $0x238] sm:$0xf0] }
 0x2c2   : > { %v3716_v8 = vor.u32 %v4090_v62, %v3713_v63  ;;  %v3764_v62 = vor.u32 %v4102_v59, %v3761_v61  ;;  %v4027_v63 = vld [vmem:[#allocation11 + $0x1c] sm:$0xf] }
 0x2c3   : > { %v1792_v14 = vsel %vm1791_vm9, %v4237_v40, %v1788_v9  ;;  %v3533_v40 = vld [vmem:[#allocation11 + $0xb4] sm:$0xf0]  ;;  %v4039_v9 = vld [vmem:[#allocation11 + $0x7c] sm:$0xf] }
 0x2c4   : > { %v1797_v42 = vsel %vm1794_vm10, %v1796_v12, %v1792_v14  ;;  %v3536_v56 = vor.u32 %v4045_v39, %v3533_v40  ;;  %2572 = vmatpush.bf16.msrb.mxu2 %v3632_v0  ;;  %v3620_v12 = vor.u32 %v4066_v2, %v3617_v3  ;;  %v4063_v14 = vld [vmem:[#allocation11 + $0x13c] sm:$0xf]  ;;  %2586 = vmatpush.bf16.msrb.mxu3 %v3716_v8  ;;  %v4081_v39 = vld [vmem:[#allocation11 + $0x1cc] sm:$0xf]  ;;  %v3461_v0 = vld [vmem:[#allocation11 + $0x24] sm:$0xf0] }
 0x2c5   : > { %v1806_v23 = vperm.slane %v1797_v42, 1  ;;  %v1799_v55 = vperm.slane %v1797_v42, 0  ;;  %2553 = vmatpush.bf16.msrb.mxu0 %v3736_v60  ;;  %v3512_v35 = vor.u32 %v4039_v9, %v3509_v10  ;;  %v3704_v42 = vor.u32 %v4087_v34, %v3701_v11  ;;  %v3653_v3 = vld [vmem:[#allocation11 + $0x1a4] sm:$0xf0]  ;;  %v4099_v9 = vld [vmem:[#allocation11 + $0x25c] sm:$0xf] }
 0x2c6   : > { %2559 = vmatpush.bf16.msrb.mxu1 %v3536_v56  ;;  %v3608_v18 = vor.u32 %v4063_v14, %v3605_v15  ;;  %v3488_v40 = vor.u32 %v4033_v37, %v3485_v38  ;;  %v3680_v44 = vor.u32 %v4081_v39, %v3677_v41  ;;  %v3572_v60 = vor.u32 %v4054_v57, %v3569_v58  ;;  %v3749_v10 = vld [vmem:[#allocation11 + $0x264] sm:$0xf0]  ;;  %v4024_v11 = vld [vmem:[#allocation11 + $0x4] sm:$0xf]  ;;  %v3641_v15 = vld [vmem:[#allocation11 + $0x18c] sm:$0xf0] }
 0x2c7   : > { %1811 = vperm.xlu1 %4229, %v1806_v23   ;;  %v3500_v23 = vor.u32 %v4036_v30, %v3497_v19  ;;  %v3464_v2 = vor.u32 %v4027_v63, %v3461_v0  ;;  %v3560_v8 = vor.u32 %v4051_v4, %v3557_v5  ;;  %v3752_v34 = vor.u32 %v4099_v9, %v3749_v10  ;;  %v3527_v57 = vld [vmem:[#allocation11 + $0x98] sm:$0xf]  ;;  %v4044_v58 = vld [vmem:[#allocation11 + $0xa0] sm:$0xf0] }
 0x2c8   : > { %2573 = vmatpush.bf16.msrb.mxu2 %v3620_v12  ;;  %2587 = vmatpush.bf16.msrb.mxu3 %v3704_v42  ;;  %v3449_v12 = vld [vmem:[#allocation11 + $0xc] sm:$0xf0]  ;;  %v4096_v42 = vld [vmem:[#allocation11 + $0x244] sm:$0xf]  ;;  %v4512_v19 = vmov 269488144   ;;  %v3528_v10 = vor.u32 %v4044_v58, %v3527_v57 }
 0x2c9   : > { %2598 = vmatpush.bf16.msra.mxu0 %v3824_v1  ;;  %v4075_v1 = vld [vmem:[#allocation11 + $0x19c] sm:$0xf]  ;;  %v3452_v14 = vor.u32 %v4024_v11, %v3449_v12  ;;  %v1816_v20 = vunpack.c.l.s4 %v4512_v19  ;;  %v3719_v63 = vld [vmem:[#allocation11 + $0x218] sm:$0xf]  ;;  %v4092_v0 = vld [vmem:[#allocation11 + $0x220] sm:$0xf0] }
 0x2ca   : > { %2560 = vmatpush.bf16.msrb.mxu1 %v3524_v6  ;;  %v3656_v6 = vor.u32 %v4075_v1, %v3653_v3  ;;  %v3623_v3 = vld [vmem:[#allocation11 + $0x158] sm:$0xf]  ;;  %v4116_v9 = vld [vmem:[#allocation11 + $0x2e0] sm:$0xf0]  ;;  %v3515_v11 = vld [vmem:[#allocation11 + $0x80] sm:$0xf] }
 0x2cb   : > { %v4041_v12 = vld [vmem:[#allocation11 + $0x88] sm:$0xf0]  ;;  %v3503_v19 = vld [vmem:[#allocation11 + $0x68] sm:$0xf]  ;;  %v4104_v57 = vld [vmem:[#allocation11 + $0x280] sm:$0xf0] }
 0x2cc   : > { %2574 = vmatpush.bf16.msrb.mxu2 %v3608_v18  ;;  %2588 = vmatpush.bf16.msrb.mxu3 %v3692_v27  ;;  %v1817_v27 = vunpack.c.0.s8 %v1816_v20  ;;  %v4038_v20 = vld [vmem:[#allocation11 + $0x70] sm:$0xf0] }
 0x2cd   : > { %2599 = vmatpush.bf16.msra.mxu0 %v3812_v13  ;;  %v4072_v13 = vld [vmem:[#allocation11 + $0x184] sm:$0xf] }
 0x2ce   : > { %2561 = vmatpush.bf16.msrb.mxu1 %v3512_v35  ;;  %v3644_v43 = vor.u32 %v4072_v13, %v3641_v15  ;;  %v3545_v35 = vld [vmem:[#allocation11 + $0xcc] sm:$0xf0]  ;;  %v3707_v13 = vld [vmem:[#allocation11 + $0x200] sm:$0xf] }
 0x2cf   : > { %1804 = vperm.xlu1 %4229, %v1799_v55   ;;  %v3665_v55 = vld [vmem:[#allocation11 + $0x1bc] sm:$0xf0]  ;;  %v3548_v18 = vor.u32 %v4048_v16, %v3545_v35  ;;  %v4065_v35 = vld [vmem:[#allocation11 + $0x148] sm:$0xf0] }
 0x2d0   : > { %2575 = vmatpush.bf16.msrb.mxu2 %v3596_v32  ;;  %2589 = vmatpush.bf16.msrb.mxu3 %v3680_v44  ;;  %v3668_v56 = vor.u32 %v4078_v53, %v3665_v55  ;;  %v4071_v53 = vld [vmem:[#allocation11 + $0x178] sm:$0xf0]  ;;  %v3540_v55 = vor.u32 %v4047_v47, %v3539_v46  ;;  %v3611_v16 = vld [vmem:[#allocation11 + $0x140] sm:$0xf]  ;;  %v3587_v46 = vld [vmem:[#allocation11 + $0x110] sm:$0xf] }
 0x2d1   : > { %2600 = vmatpush.bf16.msra.mxu0 %v3800_v7  ;;  %v3737_v7 = vld [vmem:[#allocation11 + $0x24c] sm:$0xf0]  ;;  %v4059_v47 = vld [vmem:[#allocation11 + $0x118] sm:$0xf0] }
 0x2d2   : > { %2562 = vmatpush.bf16.msrb.mxu1 %v3500_v23  ;;  %v3740_v30 = vor.u32 %v4096_v42, %v3737_v7  ;;  %v4513_v23 = vmov 842150450   ;;  %v3803_v42 = vld [vmem:[#allocation11 + $0x2c0] sm:$0xf]  ;;  %v3516_v7 = vor.u32 %v4041_v12, %v3515_v11  ;;  %v3455_v12 = vld [vmem:[#allocation11 + $0x8] sm:$0xf] }
 0x2d3   : > { %v1820_v24 = vunpack.c.l.s4 %v4513_v23  ;;  %v3695_v23 = vld [vmem:[#allocation11 + $0x1e8] sm:$0xf] }
 0x2d4   : > { %2576 = vmatpush.bf16.msrb.mxu2 %v3584_v48  ;;  %2590 = vmatpush.bf16.msrb.mxu3 %v3668_v56  ;;  %v3731_v48 = vld [vmem:[#allocation11 + $0x230] sm:$0xf] }
 0x2d5   : > { %2601 = vmatpush.bf16.msra.mxu0 %v3788_v36  ;;  %v1821_v28 = vunpack.c.0.s8 %v1820_v24  ;;  %v3732_v56 = vor.u32 %v4095_v49, %v3731_v48  ;;  %v4086_v24 = vld [vmem:[#allocation11 + $0x1f0] sm:$0xf0]  ;;  %v3779_v48 = vld [vmem:[#allocation11 + $0x290] sm:$0xf]  ;;  %v4107_v49 = vld [vmem:[#allocation11 + $0x298] sm:$0xf0] }
 0x2d6   : > { %2563 = vmatpush.bf16.msrb.mxu1 %v3488_v40 }
 0x2d8   : > { %2577 = vmatpush.bf16.msrb.mxu2 %v3572_v60  ;;  %2591 = vmatpush.bf16.msrb.mxu3 %v3656_v6  ;;  %v4068_v6 = vld [vmem:[#allocation11 + $0x160] sm:$0xf0] }
 0x2d9   : > { %2602 = vmatpush.bf16.msra.mxu0 %v3776_v50  ;;  %v3624_v15 = vor.u32 %v4068_v6, %v3623_v3  ;;  %v3563_v6 = vld [vmem:[#allocation11 + $0xe0] sm:$0xf] }
 0x2da   : > { %2564 = vmatpush.bf16.msrb.mxu1 %v3476_v54  ;;  %v4119_v54 = vld [vmem:[#allocation11 + $0x2f8] sm:$0xf0] }
 0x2dc   : > { %2578 = vmatpush.bf16.msrb.mxu2 %v3560_v8  ;;  %2592 = vmatpush.bf16.msrb.mxu3 %v3644_v43  ;;  %v3815_v8 = vld [vmem:[#allocation11 + $0x2d8] sm:$0xf] }
 0x2dd   : > { %2603 = vmatpush.bf16.msra.mxu0 %v3764_v62  ;;  %v3816_v43 = vor.u32 %v4116_v9, %v3815_v8  ;;  %v4053_v8 = vld [vmem:[#allocation11 + $0xe8] sm:$0xf0]  ;;  %v3755_v9 = vld [vmem:[#allocation11 + $0x260] sm:$0xf] }
 0x2de   : > { %2565 = vmatpush.bf16.msrb.mxu1 %v3464_v2 }
 0x2e0   : > { %2579 = vmatpush.bf16.msrb.mxu2 %v3548_v18  ;;  %v4113_v18 = vld [vmem:[#allocation11 + $0x2c8] sm:$0xf0] }
 0x2e1   : > { %2604 = vmatpush.bf16.msra.mxu0 %v3752_v34  ;;  %v3720_v34 = vor.u32 %v4092_v0, %v3719_v63  ;;  %v4029_v63 = vld [vmem:[#allocation11 + $0x28] sm:$0xf0]  ;;  %v3659_v0 = vld [vmem:[#allocation11 + $0x1a0] sm:$0xf] }
 0x2e2   : > { %2566 = vmatpush.bf16.msrb.mxu1 %v3452_v14  ;;  %v4089_v14 = vld [vmem:[#allocation11 + $0x208] sm:$0xf0] }
 0x2e5   : > { %2605 = vmatpush.bf16.msra.mxu0 %v3740_v30  ;;  %v3708_v30 = vor.u32 %v4089_v14, %v3707_v13  ;;  %v4026_v13 = vld [vmem:[#allocation11 + $0x10] sm:$0xf0]  ;;  %v3647_v14 = vld [vmem:[#allocation11 + $0x188] sm:$0xf] }
 0x339   : > { %v1812_v29 = vpop.permute.xlu1 %1811 }
 0x33a   : > { %v1826_v31 = vperm.slane %v1812_v29, %v1817_v27  ;;  %v1830_v32 = vperm.slane %v1812_v29, %v1821_v28  ;;  %v3599_v29 = vld [vmem:[#allocation11 + $0x128] sm:$0xf] }
 0x33c   : > { %v1837_v33 = vmul.f32 %v1826_v31, %v5081_v25  ;;  %v1838_v36 = vmul.f32 %v1830_v32, %v5084_v26  ;;  %v3635_v26 = vld [vmem:[#allocation11 + $0x170] sm:$0xf]  ;;  %v4062_v31 = vld [vmem:[#allocation11 + $0x130] sm:$0xf0]  ;;  %v3791_v32 = vld [vmem:[#allocation11 + $0x2a8] sm:$0xf] }
 0x33d   : > { %v3636_v1 = vor.u32 %v4071_v53, %v3635_v26  ;;  %v3479_v25 = vld [vmem:[#allocation11 + $0x38] sm:$0xf]  ;;  %v4032_v26 = vld [vmem:[#allocation11 + $0x40] sm:$0xf0]  ;;  %v3588_v53 = vor.u32 %v4059_v47, %v3587_v46 }
 0x33e   : > { %v1839_v40 = vrot.slane %v1837_v33, 4  ;;  %v1847_v41 = vrot.slane %v1838_v36, 4  ;;  %v4110_v33 = vld [vmem:[#allocation11 + $0x2b0] sm:$0xf0]  ;;  %v3504_v36 = vor.u32 %v4038_v20, %v3503_v19  ;;  %v3480_v58 = vor.u32 %v4032_v26, %v3479_v25 }
 0x341   : > { %v1805_v37 = vpop.permute.xlu1 %1804 }
 0x342   : > { %v1818_v38 = vperm.slane %v1805_v37, %v1817_v27  ;;  %v1822_v39 = vperm.slane %v1805_v37, %v1821_v28  ;;  %v3612_v27 = vor.u32 %v4065_v35, %v3611_v16  ;;  %v3804_v28 = vor.u32 %v4113_v18, %v3803_v42  ;;  %v3551_v35 = vld [vmem:[#allocation11 + $0xc8] sm:$0xf]  ;;  %v4050_v42 = vld [vmem:[#allocation11 + $0xd0] sm:$0xf0] }
 0x343   : > { %v3696_v37 = vor.u32 %v4086_v24, %v3695_v23  ;;  %v3743_v18 = vld [vmem:[#allocation11 + $0x248] sm:$0xf]  ;;  %v3552_v20 = vor.u32 %v4050_v42, %v3551_v35 }
 0x344   : > { %v1835_v44 = vmul.f32 %v1818_v38, %v5071_v21  ;;  %v1836_v45 = vmul.f32 %v1822_v39, %v5074_v22  ;;  %v3827_v22 = vld [vmem:[#allocation11 + $0x2f0] sm:$0xf]  ;;  %v4035_v39 = vld [vmem:[#allocation11 + $0x58] sm:$0xf0] }
 0x345   : > { %v3828_v2 = vor.u32 %v4119_v54, %v3827_v22  ;;  %v3491_v38 = vld [vmem:[#allocation11 + $0x50] sm:$0xf]  ;;  %v3780_v22 = vor.u32 %v4107_v49, %v3779_v48  ;;  %v3575_v54 = vld [vmem:[#allocation11 + $0xf8] sm:$0xf] }
 0x346   : > { %v1840_v50 = vsel %vm1695_vm3, %v1839_v40, %v1835_v44  ;;  %v1848_v51 = vsel %vm1695_vm3, %v1847_v41, %v1836_v45  ;;  %v3683_v40 = vld [vmem:[#allocation11 + $0x1d0] sm:$0xf]  ;;  %v4083_v41 = vld [vmem:[#allocation11 + $0x1d8] sm:$0xf0]  ;;  %v3600_v44 = vor.u32 %v4062_v31, %v3599_v29  ;;  %v3792_v45 = vor.u32 %v4110_v33, %v3791_v32 }
 0x347   : > { %v1844_v52 = vperm.slane %v1840_v50, %v5066_v17  ;;  %v1852_v21 = vperm.slane %v1848_v51, %v5066_v17  ;;  %v3492_v50 = vor.u32 %v4035_v39, %v3491_v38  ;;  %v3684_v51 = vor.u32 %v4083_v41, %v3683_v40  ;;  %v1987_v40 = vld [vmem:[#allocation13] sm:$0x7] }
 0x348   : > { %v1990_v41 = vperm.slane %v1987_v40, 1  ;;  %v1989_v17 = vperm.slane %v1987_v40, 0  ;;  %v1991_v49 = vperm.slane %v1987_v40, 2 }
 0x349   : > { %v5112_v59 = vpack.c.bf16 %v1844_v52, %v1844_v52  ;;  %v5114_v60 = vpack.c.bf16 %v1852_v21, %v1852_v21  ;;  %v1845_v61 = vrot.slane %v1844_v52, 4  ;;  %v1853_v62 = vrot.slane %v1852_v21, 4  ;;  %v3671_v52 = vld [vmem:[#allocation11 + $0x1b8] sm:$0xf]  ;;  %v4080_v21 = vld [vmem:[#allocation11 + $0x1c0] sm:$0xf0] }
 0x34b   : > { %2515 = vmatmul.bf16.vlgmr.msra.gmra.mxu1 %v5112_v59  ;;  %2541 = vmatmul.bf16.vlgmr.msra.gmra.mxu3 %v5114_v60  ;;  %v5125_v4 = vpack.c.bf16 %v1845_v61, %v1845_v61  ;;  %v5127_v5 = vpack.c.bf16 %v1853_v62, %v1853_v62  ;;  %v3672_v61 = vor.u32 %v4080_v21, %v3671_v52  ;;  %v3467_v62 = vld [vmem:[#allocation11 + $0x20] sm:$0xf] }
 0x34c   : > { %2611 = vmatpush.bf16.msra.mxu1 %v3540_v55  ;;  %2637 = vmatpush.bf16.msra.mxu3 %v3732_v56  ;;  %v4056_v55 = vld [vmem:[#allocation11 + $0x100] sm:$0xf0]  ;;  %v3767_v56 = vld [vmem:[#allocation11 + $0x278] sm:$0xf] }
 0x34d   : > { %3833 = vmatmul.msk.bf16.vlgmr.msra.gmra.mxu2 %vm5119_vm12, %v5125_v4  ;;  %3838 = vmatmul.msk.bf16.vlgmr.msrb.gmra.mxu0 %vm5119_vm12, %v5127_v5  ;;  %v3768_v3 = vor.u32 %v4104_v57, %v3767_v56 }
 0x34e   : > { %2624 = vmatpush.bf16.msra.mxu2 %v3636_v1  ;;  %2650 = vmatpush.bf16.msrb.mxu0 %v3828_v2  ;;  %v4077_v1 = vld [vmem:[#allocation11 + $0x1a8] sm:$0xf0]  ;;  %v3576_v2 = vor.u32 %v4056_v55, %v3575_v54 }
 0x34f   : > { %v3660_v11 = vor.u32 %v4077_v1, %v3659_v0 }
 0x350   : > { %2612 = vmatpush.bf16.msra.mxu1 %v3528_v10  ;;  %2638 = vmatpush.bf16.msra.mxu3 %v3720_v34  ;;  %v4101_v10 = vld [vmem:[#allocation11 + $0x268] sm:$0xf0]  ;;  %v3468_v34 = vor.u32 %v4029_v63, %v3467_v62 }
 0x351   : > { %v3756_v16 = vor.u32 %v4101_v10, %v3755_v9 }
 0x352   : > { %2625 = vmatpush.bf16.msra.mxu2 %v3624_v15  ;;  %2651 = vmatpush.bf16.msrb.mxu0 %v3816_v43  ;;  %v4074_v15 = vld [vmem:[#allocation11 + $0x190] sm:$0xf0]  ;;  %v3564_v43 = vor.u32 %v4053_v8, %v3563_v6 }
 0x353   : > { %v3648_v19 = vor.u32 %v4074_v15, %v3647_v14 }
 0x354   : > { %2613 = vmatpush.bf16.msra.mxu1 %v3516_v7  ;;  %2639 = vmatpush.bf16.msra.mxu3 %v3708_v30  ;;  %v4098_v7 = vld [vmem:[#allocation11 + $0x250] sm:$0xf0]  ;;  %v3456_v30 = vor.u32 %v4026_v13, %v3455_v12 }
 0x355   : > { %v3744_v23 = vor.u32 %v4098_v7, %v3743_v18 }
 0x356   : > { %2626 = vmatpush.bf16.msra.mxu2 %v3612_v27  ;;  %2652 = vmatpush.bf16.msrb.mxu0 %v3804_v28 }
 0x358   : > { %2614 = vmatpush.bf16.msra.mxu1 %v3504_v36  ;;  %2640 = vmatpush.bf16.msra.mxu3 %v3696_v37 }
 0x35a   : > { %2627 = vmatpush.bf16.msra.mxu2 %v3600_v44  ;;  %2653 = vmatpush.bf16.msrb.mxu0 %v3792_v45 }
 0x35b   : > { %2567 = vmatmul.bf16.vlgmr.msrb.gmra.mxu1 %v5112_v59  ;;  %2593 = vmatmul.bf16.vlgmr.msrb.gmra.mxu3 %v5114_v60 }
 0x35c   : > { %2615 = vmatpush.bf16.msra.mxu1 %v3492_v50  ;;  %2641 = vmatpush.bf16.msra.mxu3 %v3684_v51 }
 0x35d   : > { %3843 = vmatmul.msk.bf16.vlgmr.msrb.gmra.mxu2 %vm5119_vm12, %v5125_v4  ;;  %3848 = vmatmul.msk.bf16.vlgmr.msra.gmra.mxu0 %vm5119_vm12, %v5127_v5 }
 0x35e   : > { %2628 = vmatpush.bf16.msra.mxu2 %v3588_v53  ;;  %2654 = vmatpush.bf16.msrb.mxu0 %v3780_v22 }
 0x360   : > { %2616 = vmatpush.bf16.msra.mxu1 %v3480_v58  ;;  %2642 = vmatpush.bf16.msra.mxu3 %v3672_v61 }
 0x362   : > { %2629 = vmatpush.bf16.msra.mxu2 %v3576_v2  ;;  %2655 = vmatpush.bf16.msrb.mxu0 %v3768_v3 }
 0x364   : > { %2617 = vmatpush.bf16.msra.mxu1 %v3468_v34  ;;  %2643 = vmatpush.bf16.msra.mxu3 %v3660_v11 }
 0x366   : > { %2630 = vmatpush.bf16.msra.mxu2 %v3564_v43  ;;  %2656 = vmatpush.bf16.msrb.mxu0 %v3756_v16 }
 0x368   : > { %2618 = vmatpush.bf16.msra.mxu1 %v3456_v30  ;;  %2644 = vmatpush.bf16.msra.mxu3 %v3648_v19 }
 0x36a   : > { %2631 = vmatpush.bf16.msra.mxu2 %v3552_v20  ;;  %2657 = vmatpush.bf16.msrb.mxu0 %v3744_v23 }
 0x36b   : > { %2619 = vmatmul.bf16.vlgmr.msra.gmra.mxu1 %v5112_v59  ;;  %2645 = vmatmul.bf16.vlgmr.msra.gmra.mxu3 %v5114_v60 }
 0x36d   : > { %3853 = vmatmul.msk.bf16.vlgmr.msra.gmra.mxu2 %vm5119_vm12, %v5125_v4  ;;  %3858 = vmatmul.msk.bf16.vlgmr.msrb.gmra.mxu0 %vm5119_vm12, %v5127_v5 }
 0x3c8   : > { %v2516_v24 = vpop.f32.mrf.mxu1 }
 0x3c9   : > { %v2517_v50 = vadd.f32 %v2516_v24, %v1989_v17 }
 0x3ca   : > { %v2555_v27 = vpop.f32.mrf.mxu0 }
 0x3ce   : > { %v2542_v28 = vpop.f32.mrf.mxu3 }
 0x3d0   : > { %v2518_v29 = vpop.f32.mrf.mxu1  ;;  %v2529_v31 = vpop.f32.mrf.mxu2 }
 0x3d1   : > { %v2530_v25 = vadd.f32 %v2529_v31, %v2517_v50 }
 0x3d2   : > { %v2557_v32 = vpop.f32.mrf.mxu0 }
 0x3d3   : > { %v2543_v55 = vadd.f32 %v2542_v28, %v2530_v25 }
 0x3d5   : > { %v2556_v62 = vadd.f32 %v2555_v27, %v2543_v55 }
 0x3d6   : > { %v2544_v33 = vpop.f32.mrf.mxu3 }
 0x3d8   : > { %v2531_v36 = vpop.f32.mrf.mxu2  ;;  %v2568_v37 = vpop.f32.mrf.mxu1 }
 0x3d9   : > { %v2569_v44 = vadd.f32 %v2568_v37, %v1990_v41 }
 0x3da   : > { %v2607_v59 = vpop.f32.mrf.mxu0 }
 0x3de   : > { %v2594_v38 = vpop.f32.mrf.mxu3 }
 0x3e0   : > { %v2570_v60 = vpop.f32.mrf.mxu1  ;;  %v2581_v39 = vpop.f32.mrf.mxu2 }
 0x3e1   : > { %v2582_v5 = vadd.f32 %v2581_v39, %v2569_v44 }
 0x3e2   : > { %v2609_v4 = vpop.f32.mrf.mxu0 }
 0x3e3   : > { %v2595_v51 = vadd.f32 %v2594_v38, %v2582_v5 }
 0x3e5   : > { %v2608_v21 = vadd.f32 %v2607_v59, %v2595_v51 }
 0x3e6   : > { %v2596_v45 = vpop.f32.mrf.mxu3 }
 0x3e7   : > { %v2666_v58 = vrot.slane %v2608_v21, 6 }
 0x3e8   : > { %v2583_v46 = vpop.f32.mrf.mxu2  ;;  %v2620_v47 = vpop.f32.mrf.mxu1 }
 0x3e9   : > { %v2621_v52 = vadd.f32 %v2620_v47, %v1991_v49  ;;  %v2668_v1 = vsel %vm1658_vm0, %v2556_v62, %v2666_v58 }
 0x3ea   : > { %v2659_v48 = vpop.f32.mrf.mxu0 }
 0x3ee   : > { %v2646_v26 = vpop.f32.mrf.mxu3 }
 0x3f0   : > { %v2622_v53 = vpop.f32.mrf.mxu1  ;;  %v2633_v22 = vpop.f32.mrf.mxu2 }
 0x3f1   : > { %v2634_v54 = vadd.f32 %v2633_v22, %v2621_v52 }
 0x3f2   : > { %v2661_v56 = vpop.f32.mrf.mxu0 }
 0x3f3   : > { %v2647_v57 = vadd.f32 %v2646_v26, %v2634_v54 }
 0x3f5   : > { %v2660_v61 = vadd.f32 %v2659_v48, %v2647_v57 }
 0x3f6   : > { %v2648_v63 = vpop.f32.mrf.mxu3 }
 0x3f7   : > { %v2667_v0 = vrot.slane %v2660_v61, 4 }
 0x3f8   : > { %v2635_v2 = vpop.f32.mrf.mxu2 }
 0x3f9   : > { %v2669_v3 = vsel %vm1662_vm2, %v2668_v1, %v2667_v0 }
 0x3fa   : > { %2671 = vst [vmem:[%s5176_s7] sm:$0x3f] %v2669_v3 }
 0x3fb PF: > { %p22_p3 = scmp.ge.s32.totalorder %s4619_s19, 5   ;;  %s5187_s24 = smov %s4490_s25 }
 0x3fc   : > { %s5188_s25 = smov %s4494_s26  ;;  %s5189_s26 = smov %s4630_s22 }
 0x3fd   : > { %s5190_s27 = smov %s4619_s19  ;;  %24 = sbr.rel (!%p22_p3) target bundleno = 9 (0x9), region = 129 }
 0x402   :  { %2683 = vsyncpa [#allocation4], 1 }
 0x403   :  { %2685 = vsyncpa [#allocation4 + $0x1], 1 }
 0x404   :  { %2686 = vsyncpa [#allocation6], 1 }
 0x405   :  { %2688 = vsyncpa [#allocation6 + $0x1], 1 }
 0x406   :  { %2689 = vsyncpa [#allocation9], 1 }
 0x407   :  { %2690 = vsyncpa [#allocation12], 1 }

</bundles_post_ra>
